<compile_context>
chip_gen: v7x
topology: tpu7x:2x2x1
jax: 0.10.0
libtpu: 0.0.40
codegen_flags: <defaults>
</compile_context>

<pallas_src>
import numpy as np
import jax
import jax.numpy as jnp
from jax.experimental import pallas as pl
from jax.experimental.pallas import tpu as pltpu


def _round_up(a, m):
    return ((a + m - 1) // m) * m


# ----------------------------------------------------------------------------
# In-kernel exact-ish GELU (torch nn.GELU default = erf-based).
# erf via Abramowitz & Stegun 7.1.26 rational poly (|err| < 1.5e-7), built only
# from ops guaranteed to lower on Mosaic.  The divide is routed to the EUP via
# pl.reciprocal(approx=True) so it does not occupy a VALU slot.
# ----------------------------------------------------------------------------
def _erf_in_kernel(x):
    p = 0.3275911
    a1, a2, a3, a4, a5 = (0.254829592, -0.284496736, 1.421413741,
                          -1.453152027, 1.061405429)
    ax = jnp.abs(x)
    t = pl.reciprocal(1.0 + p * ax, approx=True)
    poly = ((((a5 * t + a4) * t + a3) * t + a2) * t + a1) * t
    y = 1.0 - poly * jnp.exp(-ax * ax)
    return jnp.where(x >= 0.0, y, -y)


def _gelu_in_kernel(x):
    return 0.5 * x * (1.0 + _erf_in_kernel(x * 0.7071067811865476))


# ----------------------------------------------------------------------------
# Pallas MLP kernel on the packed (lane-dense) layout.
#   h = x_packed; for each layer: h = h @ W_big + b_big; GELU between layers.
# All packing lives in the wrapper; the body is a plain MXU matmul + VPU chain.
# ----------------------------------------------------------------------------
def make_mlp_kernel(num_layers):
    def kernel(x_ref, *rest):
        *wb_refs, o_ref = rest
        h = x_ref[...]
        for l in range(num_layers):
            w = wb_refs[2 * l][...]
            b = wb_refs[2 * l + 1][...]
            # Cast activations to the weight dtype (bf16 on v5e, f32 otherwise);
            # accumulate in f32 on the MXU.
            h = jnp.dot(h.astype(w.dtype), w,
                        preferred_element_type=jnp.float32) + b
            if l < num_layers - 1:
                h = _gelu_in_kernel(h)
        o_ref[...] = h.astype(o_ref.dtype)
    return kernel


# ----------------------------------------------------------------------------
# One-time weight preparation (cached at init; NOT rebuilt per forward call).
# Block-diagonal (kron) expansion so all layer widths are 128-lane multiples:
#   W_big[j*din + d, j*dout + c] = W[d, c], zero elsewhere.
# ----------------------------------------------------------------------------
def prepare_packed_params(weights, biases, *, patch_size,
                          operand_dtype=jnp.float32):
    # TODO(synk): lane packing assumes patch_size divides 128 (true for the
    # chatts config patch_size=8); other patch sizes would need a padded row.
    assert 128 % patch_size == 0, "patch_size must divide 128"
    G = 128 // patch_size
    eye_g = np.eye(G, dtype=np.float32)
    packed = []
    for w, b in zip(weights, biases):
        w_np = np.asarray(w, np.float32)
        b_np = np.asarray(b, np.float32).reshape(1, -1)
        w_big = np.kron(eye_g, w_np)          # (G*din, G*dout) block-diagonal
        b_big = np.tile(b_np, (1, G))         # (1, G*dout)
        packed.append((jnp.asarray(w_big, dtype=operand_dtype),
                       jnp.asarray(b_big, dtype=jnp.float32)))
    return packed


def _default_operand_dtype():
    # bf16 operands make the (16x zero-MAC) kron matmul single-pass on v5e's
    # MXU, where this kernel sits near the compute roofline.  Keep f32 on
    # v6e/v7x where the MXU has slack and precision is free.
    try:
        kind = jax.devices()[0].device_kind.lower()
    except Exception:
        return jnp.float32
    if "v5 lite" in kind or "v5e" in kind or "v5lite" in kind:
        return jnp.bfloat16
    return jnp.float32


# ----------------------------------------------------------------------------
# Tiling selection: large tiles (amortize per-step overhead) but keep >=2 grid
# steps when there is enough work, so v7x's two TensorCores both get a share of
# the "parallel" grid axis.  Padding target is chosen so tile divides n_pad.
# ----------------------------------------------------------------------------
def _choose_tiling(n, max_tile_rows):
    n_pad = _round_up(n, 128)
    steps = -(-n_pad // max_tile_rows)            # ceil
    if n_pad >= 256:
        steps = max(steps, 2)                     # v7x: >=2 steps to shard TCs
    tile = _round_up(-(-n_pad // steps), 128)     # multiple of 128 rows
    n_pad = steps * tile
    return n_pad, tile


# ----------------------------------------------------------------------------
# Patch MLP entry point.  x_patches_np: host NumPy (N, patch_size) float32.
# Returns (out_padded (n_pad, hidden), n).  Rows [n:] are invalid padding; the
# caller slices [:n] (or indexes lazily) — keeps the kernel path free of the
# zeros+scatter / slice-copy traffic flagged in the perf review.
# ----------------------------------------------------------------------------
def mlp_pallas(x_patches_np, packed_params, *, hidden_size,
               max_tile_rows=8192, out_dtype=jnp.float32):
    x_patches_np = np.asarray(x_patches_np, np.float32)
    n, p = x_patches_np.shape
    if n == 0:
        return jnp.zeros((0, hidden_size), out_dtype), 0

    G = 128 // p
    n_pad, tile_rows = _choose_tiling(n, max_tile_rows)

    # Host-side pad + lane packing: (n_pad, p) -> (n_pad/G, 128).  A single H2D
    # copy of the already-packed buffer; no device-side zeros/scatter/pad ops.
    xp = np.zeros((n_pad, p), np.float32)
    xp[:n] = x_patches_np
    xp = jnp.asarray(xp.reshape(n_pad // G, G * p))

    num_layers = len(packed_params)
    in_specs = [pl.BlockSpec((tile_rows // G, G * p), lambda i: (i, 0))]
    args = [xp]
    for w_big, b_big in packed_params:
        # Constant index_map -> weights/biases stay VMEM-resident across steps.
        # TODO(synk): pipeline_mode=pl.Buffered(1) would save one resident
        # weight buffer on v7x; omitted to keep lowering maximally portable.
        in_specs.append(pl.BlockSpec(w_big.shape, lambda i: (0, 0)))
        in_specs.append(pl.BlockSpec(b_big.shape, lambda i: (0, 0)))
        args.append(w_big)
        args.append(b_big)

    out_packed = pl.pallas_call(
        make_mlp_kernel(num_layers),
        out_shape=jax.ShapeDtypeStruct((n_pad // G, G * hidden_size), out_dtype),
        grid=(n_pad // tile_rows,),
        in_specs=in_specs,
        out_specs=pl.BlockSpec((tile_rows // G, G * hidden_size),
                               lambda i: (i, 0)),
        compiler_params=pltpu.CompilerParams(
            dimension_semantics=("parallel",),
            vmem_limit_bytes=32 * 1024 * 1024),
    )(*args)

    out_padded = out_packed.reshape(n_pad, hidden_size)
    return out_padded, n


# ----------------------------------------------------------------------------
# Pure-JAX reference using the exact erf-based GELU (matches torch nn.GELU),
# so the kernel's poly-erf + approx reciprocal + MXU precision are all checked.
# ----------------------------------------------------------------------------
def mlp_reference(x_patches, weights, biases):
    h = jnp.asarray(x_patches, jnp.float32)
    for l, (w, b) in enumerate(zip(weights, biases)):
        h = h @ w + b
        if l < len(weights) - 1:
            h = 0.5 * h * (1.0 + jax.lax.erf(h * 0.7071067811865476))
    return h


# ----------------------------------------------------------------------------
# Host-side glue: mask -> valid lengths -> per-sample patching (ragged, data
# dependent; mirrors the PyTorch loop that uses .item()).
# TODO(synk): per-sample ragged patch extraction is inherently dynamic-shape /
# host-driven; for large batches replace with vectorized device-side extraction
# padded to a max patch count, feeding the same packed kernel.
# ----------------------------------------------------------------------------
def build_patches(x, *, patch_size, num_features):
    x = np.asarray(x)
    batch_size = x.shape[0]
    x = x.reshape(batch_size, -1, num_features)
    mask = x[:, :, -1].astype(np.int64)
    valid_lengths = mask.sum(axis=1)
    patch_cnt = (valid_lengths + patch_size - 1) // patch_size

    patches_list = []
    for i in range(batch_size):
        vl = int(valid_lengths[i])
        pc = int(patch_cnt[i])
        if pc == 0:
            continue
        xi = x[i, :vl, 0:1].astype(np.float32)        # values only (feature 0)
        pad = pc * patch_size - vl
        if pad > 0:
            xi = np.concatenate([xi, np.zeros((pad, 1), np.float32)], axis=0)
        patches_list.append(xi.reshape(pc, patch_size))

    if patches_list:
        x_patches = np.concatenate(patches_list, axis=0)
    else:
        x_patches = np.zeros((0, patch_size), np.float32)
    return x_patches, patch_cnt.astype(np.int32)


# ----------------------------------------------------------------------------
# Module wrapper (parameters + forward)
# ----------------------------------------------------------------------------
def init_linear(key, fan_in, fan_out):
    # torch nn.Linear default init: U(-1/sqrt(fan_in), 1/sqrt(fan_in))
    kw, kb = jax.random.split(key)
    bound = 1.0 / np.sqrt(fan_in)
    w = jax.random.uniform(kw, (fan_in, fan_out), jnp.float32, -bound, bound)
    b = jax.random.uniform(kb, (1, fan_out), jnp.float32, -bound, bound)
    return w, b


def init_params(key, config):
    patch_size = config["patch_size"]
    num_layers = config["num_layers"]
    hidden = config["hidden_size"]
    input_size = patch_size  # no position embedding / idx branch
    weights, biases = [], []
    for _ in range(num_layers - 1):
        key, sub = jax.random.split(key)
        w, b = init_linear(sub, input_size, hidden)
        weights.append(w)
        biases.append(b)
        input_size = hidden
    key, sub = jax.random.split(key)
    w, b = init_linear(sub, input_size, hidden)
    weights.append(w)
    biases.append(b)
    return weights, biases


def time_series_embedding_forward(x, packed_params, config, *,
                                  max_tile_rows=8192):
    x_patches, patch_cnt = build_patches(
        x, patch_size=config["patch_size"], num_features=config["num_features"])
    out_padded, n = mlp_pallas(x_patches, packed_params,
                               hidden_size=config["hidden_size"],
                               max_tile_rows=max_tile_rows)
    # Compact to exactly N rows to match the torch module's output contract.
    out = out_padded[:n] if n else out_padded
    return out, jnp.asarray(patch_cnt, jnp.int32)


# ----------------------------------------------------------------------------
if __name__ == "__main__":
    config = {
        "patch_size": 8,
        "num_layers": 2,
        "hidden_size": 32,
        "num_features": 2,
        "max_length": 64,
        "use_position_embedding": False,
        "use_position_idx": False,
    }

    key = jax.random.PRNGKey(0)
    key, kx, kp = jax.random.split(key, 3)

    # x: (batch=2, seq=16, num_features=2); feature 0 = value, feature 1 = mask
    batch, seq = 2, 16
    values = jax.random.normal(kx, (batch, seq, 1), jnp.float32)
    valid_lengths = np.array([13, 16], dtype=np.int32)
    mask = np.zeros((batch, seq, 1), dtype=np.float32)
    for i, vl in enumerate(valid_lengths):
        mask[i, :vl, 0] = 1.0
    x = jnp.concatenate([values, jnp.asarray(mask)], axis=-1)

    weights, biases = init_params(kp, config)

    # One-time (cached) kron expansion; bf16 operands auto-selected on v5e.
    packed_params = prepare_packed_params(
        weights, biases, patch_size=config["patch_size"],
        operand_dtype=_default_operand_dtype())

    out, patch_cnt = time_series_embedding_forward(x, packed_params, config)
    out = jax.block_until_ready(out)
    patch_cnt = jax.block_until_ready(patch_cnt)

    assert out.shape == (int(patch_cnt.sum()), config["hidden_size"])
    assert out.dtype == jnp.float32

    # Numerical check against a plain-XLA reference with torch's exact
    # erf-based GELU (tolerance covers poly-erf, approx reciprocal, MXU/bf16).
    x_patches, _ = build_patches(
        x, patch_size=config["patch_size"], num_features=config["num_features"])
    ref = jax.block_until_ready(mlp_reference(x_patches, weights, biases))
    np.testing.assert_allclose(np.asarray(out), np.asarray(ref),
                               rtol=5e-2, atol=5e-2)

    print("KERNEL_OK")
</pallas_src>

<mosaic_0001>
module attributes {stable_mosaic.version = 11 : i64} {
  func.func @kernel(%arg0: i32, %arg1: memref<8x128xf32, #tpu.memory_space<vmem>>, %arg2: memref<128x512xf32, #tpu.memory_space<vmem>>, %arg3: memref<1x512xf32, #tpu.memory_space<vmem>>, %arg4: memref<512x512xf32, #tpu.memory_space<vmem>>, %arg5: memref<1x512xf32, #tpu.memory_space<vmem>>, %arg6: memref<8x512xf32, #tpu.memory_space<vmem>>) attributes {dimension_semantics = [#tpu.dimension_semantics<parallel>], iteration_bounds = array<i64: 1>, scalar_prefetch = 0 : i64, scratch_operands = 0 : i64, tpu.core_type = #tpu.core_type<tc>, window_params = [{transform_indices = @transform_0, window_bounds = array<i64: 8, 128>}, {pipeline_mode = #tpu.pipeline_mode<synchronous>, transform_indices = @transform_1, window_bounds = array<i64: 128, 512>}, {pipeline_mode = #tpu.pipeline_mode<synchronous>, transform_indices = @transform_2, window_bounds = array<i64: 1, 512>}, {pipeline_mode = #tpu.pipeline_mode<synchronous>, transform_indices = @transform_3, window_bounds = array<i64: 512, 512>}, {pipeline_mode = #tpu.pipeline_mode<synchronous>, transform_indices = @transform_4, window_bounds = array<i64: 1, 512>}, {transform_indices = @transform_5, window_bounds = array<i64: 8, 512>}]} {
    %c0 = arith.constant 0 : index
    %c0_0 = arith.constant 0 : index
    %0 = vector.load %arg1[%c0, %c0_0] : memref<8x128xf32, #tpu.memory_space<vmem>>, vector<8x128xf32>
    %c0_1 = arith.constant 0 : index
    %c0_2 = arith.constant 0 : index
    %1 = vector.load %arg2[%c0_1, %c0_2] : memref<128x512xf32, #tpu.memory_space<vmem>>, vector<128x512xf32>
    %c0_3 = arith.constant 0 : index
    %c0_4 = arith.constant 0 : index
    %2 = vector.load %arg3[%c0_3, %c0_4] : memref<1x512xf32, #tpu.memory_space<vmem>>, vector<1x512xf32>
    %cst = arith.constant dense<0.000000e+00> : vector<8x512xf32>
    %3 = tpu.matmul %0, %1, %cst {dimension_numbers = #tpu.dot_dimension_numbers<[1], [0], [0], [1], [0, 0, 1, 1], [], []>} : vector<8x128xf32>, vector<128x512xf32>, vector<8x512xf32> -> vector<8x512xf32>
    %4 = vector.broadcast %2 : vector<1x512xf32> to vector<8x512xf32>
    %5 = arith.addf %3, %4 : vector<8x512xf32>
    %cst_5 = arith.constant 5.000000e-01 : f32
    %6 = vector.broadcast %cst_5 : f32 to vector<8x512xf32>
    %7 = arith.mulf %6, %5 : vector<8x512xf32>
    %cst_6 = arith.constant 0.707106769 : f32
    %8 = vector.broadcast %cst_6 : f32 to vector<8x512xf32>
    %9 = arith.mulf %5, %8 : vector<8x512xf32>
    %10 = math.absf %9 : vector<8x512xf32>
    %cst_7 = arith.constant 0.327591091 : f32
    %11 = vector.broadcast %cst_7 : f32 to vector<8x512xf32>
    %12 = arith.mulf %11, %10 : vector<8x512xf32>
    %cst_8 = arith.constant 1.000000e+00 : f32
    %13 = vector.broadcast %cst_8 : f32 to vector<8x512xf32>
    %14 = arith.addf %13, %12 : vector<8x512xf32>
    %15 = tpu.reciprocal %14 {approx = true} : vector<8x512xf32> -> vector<8x512xf32>
    %cst_9 = arith.constant 1.06140542 : f32
    %16 = vector.broadcast %cst_9 : f32 to vector<8x512xf32>
    %17 = arith.mulf %16, %15 : vector<8x512xf32>
    %cst_10 = arith.constant -1.45315206 : f32
    %18 = vector.broadcast %cst_10 : f32 to vector<8x512xf32>
    %19 = arith.addf %17, %18 : vector<8x512xf32>
    %20 = arith.mulf %19, %15 : vector<8x512xf32>
    %cst_11 = arith.constant 1.42141378 : f32
    %21 = vector.broadcast %cst_11 : f32 to vector<8x512xf32>
    %22 = arith.addf %20, %21 : vector<8x512xf32>
    %23 = arith.mulf %22, %15 : vector<8x512xf32>
    %cst_12 = arith.constant -0.284496725 : f32
    %24 = vector.broadcast %cst_12 : f32 to vector<8x512xf32>
    %25 = arith.addf %23, %24 : vector<8x512xf32>
    %26 = arith.mulf %25, %15 : vector<8x512xf32>
    %cst_13 = arith.constant 0.254829586 : f32
    %27 = vector.broadcast %cst_13 : f32 to vector<8x512xf32>
    %28 = arith.addf %26, %27 : vector<8x512xf32>
    %29 = arith.mulf %28, %15 : vector<8x512xf32>
    %cst_14 = arith.constant 0.000000e+00 : f32
    %30 = vector.broadcast %cst_14 : f32 to vector<8x512xf32>
    %31 = arith.subf %30, %10 : vector<8x512xf32>
    %32 = arith.mulf %31, %10 : vector<8x512xf32>
    %33 = math.exp %32 : vector<8x512xf32>
    %34 = arith.mulf %29, %33 : vector<8x512xf32>
    %cst_15 = arith.constant 1.000000e+00 : f32
    %35 = vector.broadcast %cst_15 : f32 to vector<8x512xf32>
    %36 = arith.subf %35, %34 : vector<8x512xf32>
    %cst_16 = arith.constant 0.000000e+00 : f32
    %37 = vector.broadcast %cst_16 : f32 to vector<8x512xf32>
    %38 = arith.cmpf oge, %9, %37 : vector<8x512xf32>
    %cst_17 = arith.constant 0.000000e+00 : f32
    %39 = vector.broadcast %cst_17 : f32 to vector<8x512xf32>
    %40 = arith.subf %39, %36 : vector<8x512xf32>
    %41 = arith.select %38, %36, %40 : vector<8x512xi1>, vector<8x512xf32>
    %cst_18 = arith.constant 1.000000e+00 : f32
    %42 = vector.broadcast %cst_18 : f32 to vector<8x512xf32>
    %43 = arith.addf %42, %41 : vector<8x512xf32>
    %44 = arith.mulf %7, %43 : vector<8x512xf32>
    %c0_19 = arith.constant 0 : index
    %c0_20 = arith.constant 0 : index
    %45 = vector.load %arg4[%c0_19, %c0_20] : memref<512x512xf32, #tpu.memory_space<vmem>>, vector<512x512xf32>
    %c0_21 = arith.constant 0 : index
    %c0_22 = arith.constant 0 : index
    %46 = vector.load %arg5[%c0_21, %c0_22] : memref<1x512xf32, #tpu.memory_space<vmem>>, vector<1x512xf32>
    %cst_23 = arith.constant dense<0.000000e+00> : vector<8x512xf32>
    %47 = tpu.matmul %44, %45, %cst_23 {dimension_numbers = #tpu.dot_dimension_numbers<[1], [0], [0], [1], [0, 0, 1, 1], [], []>} : vector<8x512xf32>, vector<512x512xf32>, vector<8x512xf32> -> vector<8x512xf32>
    %48 = vector.broadcast %46 : vector<1x512xf32> to vector<8x512xf32>
    %49 = arith.addf %47, %48 : vector<8x512xf32>
    %c0_24 = arith.constant 0 : index
    %c0_25 = arith.constant 0 : index
    %50 = vector.load %arg6[%c0_24, %c0_25] : memref<8x512xf32, #tpu.memory_space<vmem>>, vector<8x512xf32>
    tpu.vector_store %arg6[%c0_24, %c0_25], %49 {strides = array<i32>} : memref<8x512xf32, #tpu.memory_space<vmem>>, vector<8x512xf32>,
    return
  }
  func.func @transform_0(%arg0: i32) -> (i32, i32) {
    %c0_i32 = arith.constant 0 : i32
    %c0_i32_0 = arith.constant 0 : i32
    return %arg0, %c0_i32 : i32, i32
  }
  func.func @transform_1(%arg0: i32) -> (i32, i32) {
    %c0_i32 = arith.constant 0 : i32
    %c0_i32_0 = arith.constant 0 : i32
    %c0_i32_1 = arith.constant 0 : i32
    return %c0_i32, %c0_i32_0 : i32, i32
  }
  func.func @transform_2(%arg0: i32) -> (i32, i32) {
    %c0_i32 = arith.constant 0 : i32
    %c0_i32_0 = arith.constant 0 : i32
    %c0_i32_1 = arith.constant 0 : i32
    return %c0_i32, %c0_i32_0 : i32, i32
  }
  func.func @transform_3(%arg0: i32) -> (i32, i32) {
    %c0_i32 = arith.constant 0 : i32
    %c0_i32_0 = arith.constant 0 : i32
    %c0_i32_1 = arith.constant 0 : i32
    return %c0_i32, %c0_i32_0 : i32, i32
  }
  func.func @transform_4(%arg0: i32) -> (i32, i32) {
    %c0_i32 = arith.constant 0 : i32
    %c0_i32_0 = arith.constant 0 : i32
    %c0_i32_1 = arith.constant 0 : i32
    return %c0_i32, %c0_i32_0 : i32, i32
  }
  func.func @transform_5(%arg0: i32) -> (i32, i32) {
    %c0_i32 = arith.constant 0 : i32
    %c0_i32_0 = arith.constant 0 : i32
    return %arg0, %c0_i32 : i32, i32
  }
}

</mosaic_0001>

<bundles_post_ra>
// kernel: tpu_custom_call.1
= control target key start
LH: loop header
LB: loop body
LE: loop exit
PB: predicated region body
PF: predicated region fallthrough
CT: control target
= control target key end

     0   :  { %10 = vsyncpa [#allocation3], 0  ;;  %s1585_s0 = inlined_call_operand.hbm [shape: f32[8,128], index: 0, kind: input, shape index: {}]   ;;  %s1586_s1 = inlined_call_operand.hbm [shape: f32[128,512], index: 1, kind: input, shape index: {}]   ;;  %s1587_s2 = inlined_call_operand.vmem [shape: f32[1,512], index: 2, kind: input, shape index: {}]   ;;  %s1588_s3 = inlined_call_operand.hbm [shape: f32[512,512], index: 3, kind: input, shape index: {}]   ;;  %s1589_s4 = inlined_call_operand.vmem [shape: f32[1,512], index: 4, kind: input, shape index: {}]   ;;  %s1590_s5 = inlined_call_operand.hbm [shape: f32[8,512], index: 5, kind: output, shape index: {}]  }
   0x1   :  { %11 = vsyncpa [#allocation6], 0 }
   0x2   :  { %12 = vsyncpa [#allocation4], 0  ;;  %s1420_s18 = smov [#allocation5]   ;;  %s1326_s22 = scalar_lea.hbm %s1586_s1, 8192 }
   0x3   :  { %s28_s19 = sshll.u32 %s1420_s18, 4  ;;  %p1327_p0 = scmp.ne.s32.totalorder %s1586_s1, %s1326_s22  ;;  %s29_s19 = int_to_ptr.vmem [resolvable:$true] %s28_s19 }
   0x4   :  { %p1330_p1 = scmp.lt.u32.totalorder %s1326_s22, %s1586_s1 }
   0x6   :  { %p1332_p2 = pnand %p1330_p1, %p1327_p0 }
   0x8   :  { %1335 = shalt.err (!%p1332_p2)
}
   0x9   :  { %s1336_s27 = scalar_lea.vmem %s29_s19, 8192  ;;  %p1341_p4 = scmp.lt.s32.totalorder %s29_s19, %s29_s19 }
   0xa   :  { %p1337_p3 = scmp.ne.s32.totalorder %s29_s19, %s1336_s27  ;;  %p1342_p5 = scmp.lt.s32.totalorder %s1336_s27, %s1336_s27 }
   0xc   :  { %p1343_p6 = por %p1342_p5, %p1341_p4 }
   0xe   :  { %p1344_p7 = pnand %p1343_p6, %p1337_p3 }
  0x10   :  { %1347 = shalt.err (!%p1344_p7)
}
  0x11   :  { %s1421_s28 = smov 512   ;;  %s1422_s29 = smov 32  }
  0x12   :  { %34 = dma.hbm_to_vmem [thread:$0]  %s1586_s1, 8192, %s29_s19, [#allocation6], %s1421_s28, %s1421_s28, %s1422_s29  }
  0x13   :  { %s1423_s7 = smov [#allocation2]   ;;  %s1424_s9 = smov [#allocation7]  }
  0x14   :  { %s19_s8 = sshll.u32 %s1423_s7, 4  ;;  %s42_s10 = sshll.u32 %s1424_s9, 4  ;;  %s20_s8 = int_to_ptr.vmem [resolvable:$true] %s19_s8  ;;  %s43_s10 = int_to_ptr.vmem [resolvable:$true] %s42_s10 }
  0x15   :  { %s1348_s13 = scalar_lea.hbm %s1585_s0, 128 }
  0x16   :  { %p1349_p8 = scmp.ne.s32.totalorder %s1585_s0, %s1348_s13  ;;  %p1352_p9 = scmp.lt.u32.totalorder %s1348_s13, %s1585_s0 }
  0x18   :  { %p1354_p10 = pnand %p1352_p9, %p1349_p8 }
  0x1a   :  { %1357 = shalt.err (!%p1354_p10)
}
  0x1b   :  { %s1358_s1 = scalar_lea.vmem %s20_s8, 128  ;;  %p1363_p12 = scmp.lt.s32.totalorder %s20_s8, %s20_s8 }
  0x1c   :  { %p1359_p11 = scmp.ne.s32.totalorder %s20_s8, %s1358_s1  ;;  %p1364_p13 = scmp.lt.s32.totalorder %s1358_s1, %s1358_s1 }
  0x1e   :  { %p1365_p0 = por %p1364_p13, %p1363_p12 }
  0x20   :  { %p1366_p1 = pnand %p1365_p0, %p1359_p11 }
  0x22   :  { %1369 = shalt.err (!%p1366_p1)
}
  0x23   :  { %22 = dma.hbm_to_vmem [thread:$0]  %s1585_s0, 128, %s20_s8, [#allocation3]  }
  0x24   :  { %s1370_s22 = scalar_lea.hbm %s1588_s3, 32768 }
  0x25   :  { %p1371_p2 = scmp.ne.s32.totalorder %s1588_s3, %s1370_s22  ;;  %p1374_p3 = scmp.lt.u32.totalorder %s1370_s22, %s1588_s3 }
  0x27   :  { %p1376_p4 = pnand %p1374_p3, %p1371_p2 }
  0x29   :  { %1379 = shalt.err (!%p1376_p4)
}
  0x2a   :  { %s1380_s27 = scalar_lea.vmem %s43_s10, 32768  ;;  %p1385_p6 = scmp.lt.s32.totalorder %s43_s10, %s43_s10 }
  0x2b   :  { %p1381_p5 = scmp.ne.s32.totalorder %s43_s10, %s1380_s27  ;;  %p1386_p7 = scmp.lt.s32.totalorder %s1380_s27, %s1380_s27 }
  0x2d   :  { %p1387_p8 = por %p1386_p7, %p1385_p6 }
  0x2f   :  { %p1388_p9 = pnand %p1387_p8, %p1381_p5 }
  0x31   :  { %1391 = shalt.err (!%p1388_p9)
}
  0x32   :  { %48 = dma.hbm_to_vmem [thread:$0]  %s1588_s3, 32768, %s43_s10, [#allocation6], %s1421_s28, %s1421_s28, %s1422_s29  }
  0x33   :  { %1414 = dma.done.wait [#allocation3], 128  }
  0x34   :  { %1415 = vsyncadd [#allocation3], 4294967168 }
  0x35   :  { %1416 = dma.done.wait [#allocation6], 40960  }
  0x36   :  { %1417 = vsyncadd [#allocation6], 4294926336  ;;  %v1425_v0 = vmov 0.0   ;;  %v62_v1 = vld [vmem:[#allocation5 + $0x8] sm:$0xff]  ;;  %v61_v3 = vld [vmem:[#allocation5] sm:$0xff]  ;;  %s1426_s6 = smov [#allocation8]  }
  0x37   :  { %211 = vmatprep.mubr.f32.mxu0 %v1425_v0  ;;  %282 = vmatprep.mubr.f32.mxu1 %v1425_v0  ;;  %v66_v2 = vld [vmem:[#allocation5 + $0x28] sm:$0xff]  ;;  %v65_v5 = vld [vmem:[#allocation5 + $0x20] sm:$0xff]  ;;  %v64_v20 = vld [vmem:[#allocation5 + $0x18] sm:$0xff]  ;;  %s965_s7 = sshll.u32 %s1426_s6, 4  ;;  %s966_s7 = int_to_ptr.vmem [resolvable:$true] %s965_s7 }
  0x38   :  { %v975_v4 = vpack.c.bf16 %v66_v2, %v62_v1  ;;  %v70_v6 = vld [vmem:[#allocation5 + $0x48] sm:$0xff]  ;;  %v977_v8 = vpack.c.bf16 %v65_v5, %v61_v3  ;;  %v69_v10 = vld [vmem:[#allocation5 + $0x40] sm:$0xff]  ;;  %v68_v21 = vld [vmem:[#allocation5 + $0x38] sm:$0xff]  ;;  %p1397_p11 = scmp.lt.s32.totalorder %s966_s7, %s966_s7 }
  0x39   :  { %v74_v7 = vld [vmem:[#allocation5 + $0x68] sm:$0xff]  ;;  %v73_v11 = vld [vmem:[#allocation5 + $0x60] sm:$0xff]  ;;  %v63_v22 = vld [vmem:[#allocation5 + $0x10] sm:$0xff]  ;;  %v1007_v27 = vpack.c.bf16 %v68_v21, %v64_v20 }
  0x3a   :  { %v979_v9 = vpack.c.bf16 %v74_v7, %v70_v6  ;;  %v78_v12 = vld [vmem:[#allocation5 + $0x88] sm:$0xff]  ;;  %976 = vmatprep.subr.bf16.mxu0 %v975_v4  ;;  %v981_v14 = vpack.c.bf16 %v73_v11, %v69_v10  ;;  %v77_v16 = vld [vmem:[#allocation5 + $0x80] sm:$0xff]  ;;  %v67_v23 = vld [vmem:[#allocation5 + $0x30] sm:$0xff] }
  0x3b   :  { %v82_v13 = vld [vmem:[#allocation5 + $0xa8] sm:$0xff]  ;;  %978 = vmatpush1.bf16.msra.mxu0 %v977_v8  ;;  %v81_v17 = vld [vmem:[#allocation5 + $0xa0] sm:$0xff]  ;;  %v1009_v28 = vpack.c.bf16 %v67_v23, %v63_v22  ;;  %v72_v31 = vld [vmem:[#allocation5 + $0x58] sm:$0xff]  ;;  %1008 = vmatprep.subr.bf16.mxu1 %v1007_v27 }
  0x3c   :  { %980 = vmatprep.subr.bf16.mxu0 %v979_v9  ;;  %v983_v15 = vpack.c.bf16 %v82_v13, %v78_v12  ;;  %v86_v18 = vld [vmem:[#allocation5 + $0xc8] sm:$0xff]  ;;  %v985_v24 = vpack.c.bf16 %v81_v17, %v77_v16  ;;  %v85_v25 = vld [vmem:[#allocation5 + $0xc0] sm:$0xff]  ;;  %v76_v32 = vld [vmem:[#allocation5 + $0x78] sm:$0xff] }
  0x3d   :  { %v90_v19 = vld [vmem:[#allocation5 + $0xe8] sm:$0xff]  ;;  %v89_v26 = vld [vmem:[#allocation5 + $0xe0] sm:$0xff]  ;;  %v1011_v34 = vpack.c.bf16 %v76_v32, %v72_v31  ;;  %v71_v35 = vld [vmem:[#allocation5 + $0x50] sm:$0xff]  ;;  %1010 = vmatpush1.bf16.msra.mxu1 %v1009_v28 }
  0x3e   :  { %v987_v29 = vpack.c.bf16 %v90_v19, %v86_v18  ;;  %v94_v30 = vld [vmem:[#allocation5 + $0x108] sm:$0xff]  ;;  %v75_v36 = vld [vmem:[#allocation5 + $0x70] sm:$0xff]  ;;  %v989_v38 = vpack.c.bf16 %v89_v26, %v85_v25  ;;  %v80_v39 = vld [vmem:[#allocation5 + $0x98] sm:$0xff] }
  0x3f   :  { %982 = vmatpush1.bf16.msra.mxu0 %v981_v14  ;;  %v98_v33 = vld [vmem:[#allocation5 + $0x128] sm:$0xff]  ;;  %v1013_v37 = vpack.c.bf16 %v75_v36, %v71_v35  ;;  %1012 = vmatprep.subr.bf16.mxu1 %v1011_v34  ;;  %v84_v40 = vld [vmem:[#allocation5 + $0xb8] sm:$0xff]  ;;  %v79_v41 = vld [vmem:[#allocation5 + $0x90] sm:$0xff] }
  0x40   :  { %984 = vmatprep.subr.bf16.mxu0 %v983_v15  ;;  %v991_v42 = vpack.c.bf16 %v98_v33, %v94_v30  ;;  %v93_v43 = vld [vmem:[#allocation5 + $0x100] sm:$0xff]  ;;  %v1015_v45 = vpack.c.bf16 %v84_v40, %v80_v39  ;;  %v83_v46 = vld [vmem:[#allocation5 + $0xb0] sm:$0xff]  ;;  %v102_v47 = vld [vmem:[#allocation5 + $0x148] sm:$0xff] }
  0x41   :  { %v97_v44 = vld [vmem:[#allocation5 + $0x120] sm:$0xff]  ;;  %v106_v48 = vld [vmem:[#allocation5 + $0x168] sm:$0xff]  ;;  %v88_v49 = vld [vmem:[#allocation5 + $0xd8] sm:$0xff]  ;;  %1014 = vmatpush1.bf16.msra.mxu1 %v1013_v37  ;;  %v1017_v50 = vpack.c.bf16 %v83_v46, %v79_v41 }
  0x42   :  { %v92_v51 = vld [vmem:[#allocation5 + $0xf8] sm:$0xff]  ;;  %v993_v52 = vpack.c.bf16 %v97_v44, %v93_v43  ;;  %v101_v53 = vld [vmem:[#allocation5 + $0x140] sm:$0xff]  ;;  %1016 = vmatprep.subr.bf16.mxu1 %v1015_v45  ;;  %v87_v55 = vld [vmem:[#allocation5 + $0xd0] sm:$0xff]  ;;  %v995_v57 = vpack.c.bf16 %v106_v48, %v102_v47 }
  0x43   :  { %986 = vmatpush1.bf16.msra.mxu0 %v985_v24  ;;  %v1019_v54 = vpack.c.bf16 %v92_v51, %v88_v49  ;;  %v91_v56 = vld [vmem:[#allocation5 + $0xf0] sm:$0xff]  ;;  %v105_v58 = vld [vmem:[#allocation5 + $0x160] sm:$0xff]  ;;  %v96_v59 = vld [vmem:[#allocation5 + $0x118] sm:$0xff] }
  0x44   :  { %988 = vmatprep.subr.bf16.mxu0 %v987_v29  ;;  %v100_v60 = vld [vmem:[#allocation5 + $0x138] sm:$0xff]  ;;  %v110_v61 = vld [vmem:[#allocation5 + $0x188] sm:$0xff]  ;;  %v1021_v63 = vpack.c.bf16 %v91_v56, %v87_v55  ;;  %v997_v0 = vpack.c.bf16 %v105_v58, %v101_v53  ;;  %v109_v1 = vld [vmem:[#allocation5 + $0x180] sm:$0xff] }
  0x45   :  { %v114_v62 = vld [vmem:[#allocation5 + $0x1a8] sm:$0xff]  ;;  %1018 = vmatpush1.bf16.msra.mxu1 %v1017_v50  ;;  %v1023_v2 = vpack.c.bf16 %v100_v60, %v96_v59  ;;  %v95_v3 = vld [vmem:[#allocation5 + $0x110] sm:$0xff]  ;;  %v113_v6 = vld [vmem:[#allocation5 + $0x1a0] sm:$0xff] }
  0x46   :  { %1020 = vmatprep.subr.bf16.mxu1 %v1019_v54  ;;  %v99_v4 = vld [vmem:[#allocation5 + $0x130] sm:$0xff]  ;;  %v999_v5 = vpack.c.bf16 %v114_v62, %v110_v61  ;;  %v104_v7 = vld [vmem:[#allocation5 + $0x158] sm:$0xff]  ;;  %v118_v9 = vld [vmem:[#allocation5 + $0x1c8] sm:$0xff]  ;;  %v1001_v12 = vpack.c.bf16 %v113_v6, %v109_v1 }
  0x47   :  { %990 = vmatpush1.bf16.msra.mxu0 %v989_v38  ;;  %v108_v8 = vld [vmem:[#allocation5 + $0x178] sm:$0xff]  ;;  %v122_v10 = vld [vmem:[#allocation5 + $0x1e8] sm:$0xff]  ;;  %v1025_v11 = vpack.c.bf16 %v99_v4, %v95_v3  ;;  %v117_v13 = vld [vmem:[#allocation5 + $0x1c0] sm:$0xff] }
  0x48   :  { %992 = vmatprep.subr.bf16.mxu0 %v991_v42  ;;  %v1027_v14 = vpack.c.bf16 %v108_v8, %v104_v7  ;;  %v103_v15 = vld [vmem:[#allocation5 + $0x150] sm:$0xff]  ;;  %v1003_v17 = vpack.c.bf16 %v122_v10, %v118_v9  ;;  %v121_v18 = vld [vmem:[#allocation5 + $0x1e0] sm:$0xff]  ;;  %v112_v19 = vld [vmem:[#allocation5 + $0x198] sm:$0xff] }
  0x49   :  { %1022 = vmatpush1.bf16.msra.mxu1 %v1021_v63  ;;  %v107_v16 = vld [vmem:[#allocation5 + $0x170] sm:$0xff]  ;;  %v116_v20 = vld [vmem:[#allocation5 + $0x1b8] sm:$0xff]  ;;  %v394_v21 = vld [vmem:[#allocation7 + $0x8] sm:$0xff]  ;;  %v1005_v24 = vpack.c.bf16 %v121_v18, %v117_v13 }
  0x4a   :  { %1024 = vmatprep.subr.bf16.mxu1 %v1023_v2  ;;  %v398_v22 = vld [vmem:[#allocation7 + $0x28] sm:$0xff]  ;;  %v1029_v23 = vpack.c.bf16 %v107_v16, %v103_v15  ;;  %v1031_v25 = vpack.c.bf16 %v116_v20, %v112_v19  ;;  %v111_v26 = vld [vmem:[#allocation5 + $0x190] sm:$0xff]  ;;  %v120_v28 = vld [vmem:[#allocation5 + $0x1d8] sm:$0xff] }
  0x4b   :  { %994 = vmatpush1.bf16.msra.mxu0 %v993_v52  ;;  %v115_v27 = vld [vmem:[#allocation5 + $0x1b0] sm:$0xff]  ;;  %v124_v29 = vld [vmem:[#allocation5 + $0x1f8] sm:$0xff]  ;;  %v1039_v30 = vpack.c.bf16 %v398_v22, %v394_v21  ;;  %v393_v31 = vld [vmem:[#allocation7] sm:$0xff] }
  0x4c   :  { %996 = vmatprep.subr.bf16.mxu0 %v995_v57  ;;  %v397_v32 = vld [vmem:[#allocation7 + $0x20] sm:$0xff]  ;;  %v402_v33 = vld [vmem:[#allocation7 + $0x48] sm:$0xff]  ;;  %v60_v35 = vld [vmem:[#allocation2] sm:$0xff]  ;;  %v1033_v36 = vpack.c.bf16 %v115_v27, %v111_v26  ;;  %v1035_v37 = vpack.c.bf16 %v124_v29, %v120_v28 }
  0x4d   :  { %1026 = vmatpush1.bf16.msra.mxu1 %v1025_v11  ;;  %v406_v34 = vld [vmem:[#allocation7 + $0x68] sm:$0xff]  ;;  %v119_v38 = vld [vmem:[#allocation5 + $0x1d0] sm:$0xff]  ;;  %v396_v40 = vld [vmem:[#allocation7 + $0x18] sm:$0xff]  ;;  %v1041_v41 = vpack.c.bf16 %v397_v32, %v393_v31 }
  0x4e   :  { %1028 = vmatprep.subr.bf16.mxu1 %v1027_v14  ;;  %v123_v39 = vld [vmem:[#allocation5 + $0x1f0] sm:$0xff]  ;;  %v400_v42 = vld [vmem:[#allocation7 + $0x38] sm:$0xff]  ;;  %v1043_v43 = vpack.c.bf16 %v406_v34, %v402_v33  ;;  %v401_v44 = vld [vmem:[#allocation7 + $0x40] sm:$0xff] }
  0x4f   :  { %998 = vmatpush1.bf16.msra.mxu0 %v997_v0  ;;  %v405_v45 = vld [vmem:[#allocation7 + $0x60] sm:$0xff]  ;;  %v410_v46 = vld [vmem:[#allocation7 + $0x88] sm:$0xff]  ;;  %v1037_v48 = vpack.c.bf16 %v123_v39, %v119_v38  ;;  %v1167_v49 = vpack.c.bf16 %v400_v42, %v396_v40  ;;  %v395_v50 = vld [vmem:[#allocation7 + $0x10] sm:$0xff] }
  0x50   :  { %1000 = vmatprep.subr.bf16.mxu0 %v999_v5  ;;  %v414_v47 = vld [vmem:[#allocation7 + $0xa8] sm:$0xff]  ;;  %v399_v51 = vld [vmem:[#allocation7 + $0x30] sm:$0xff]  ;;  %v404_v52 = vld [vmem:[#allocation7 + $0x58] sm:$0xff]  ;;  %v1045_v53 = vpack.c.bf16 %v405_v45, %v401_v44 }
  0x51   :  { %1030 = vmatpush1.bf16.msra.mxu1 %v1029_v23  ;;  %v408_v54 = vld [vmem:[#allocation7 + $0x78] sm:$0xff]  ;;  %v1047_v55 = vpack.c.bf16 %v414_v47, %v410_v46  ;;  %v409_v56 = vld [vmem:[#allocation7 + $0x80] sm:$0xff]  ;;  %v1169_v58 = vpack.c.bf16 %v399_v51, %v395_v50  ;;  %v403_v60 = vld [vmem:[#allocation7 + $0x50] sm:$0xff] }
  0x52   :  { %1032 = vmatprep.subr.bf16.mxu1 %v1031_v25  ;;  %v413_v57 = vld [vmem:[#allocation7 + $0xa0] sm:$0xff]  ;;  %v1171_v59 = vpack.c.bf16 %v408_v54, %v404_v52  ;;  %v407_v61 = vld [vmem:[#allocation7 + $0x70] sm:$0xff]  ;;  %v412_v63 = vld [vmem:[#allocation7 + $0x98] sm:$0xff] }
  0x53   :  { %1002 = vmatpush1.bf16.msra.mxu0 %v1001_v12  ;;  %v1049_v62 = vpack.c.bf16 %v413_v57, %v409_v56  ;;  %v416_v0 = vld [vmem:[#allocation7 + $0xb8] sm:$0xff]  ;;  %v1173_v1 = vpack.c.bf16 %v407_v61, %v403_v60  ;;  %v411_v3 = vld [vmem:[#allocation7 + $0x90] sm:$0xff]  ;;  %v418_v6 = vld [vmem:[#allocation7 + $0xc8] sm:$0xff] }
  0x54   :  { %1004 = vmatprep.subr.bf16.mxu0 %v1003_v17  ;;  %v1175_v2 = vpack.c.bf16 %v416_v0, %v412_v63  ;;  %v415_v4 = vld [vmem:[#allocation7 + $0xb0] sm:$0xff]  ;;  %v422_v7 = vld [vmem:[#allocation7 + $0xe8] sm:$0xff]  ;;  %v420_v8 = vld [vmem:[#allocation7 + $0xd8] sm:$0xff] }
  0x55   :  { %1034 = vmatpush1.bf16.msra.mxu1 %v1033_v36  ;;  %v1177_v5 = vpack.c.bf16 %v415_v4, %v411_v3  ;;  %v1051_v9 = vpack.c.bf16 %v422_v7, %v418_v6  ;;  %v424_v10 = vld [vmem:[#allocation7 + $0xf8] sm:$0xff]  ;;  %v417_v11 = vld [vmem:[#allocation7 + $0xc0] sm:$0xff]  ;;  %v419_v15 = vld [vmem:[#allocation7 + $0xd0] sm:$0xff] }
  0x56   :  { %1036 = vmatprep.subr.bf16.mxu1 %v1035_v37  ;;  %v421_v12 = vld [vmem:[#allocation7 + $0xe0] sm:$0xff]  ;;  %v1179_v13 = vpack.c.bf16 %v424_v10, %v420_v8  ;;  %v423_v16 = vld [vmem:[#allocation7 + $0xf0] sm:$0xff]  ;;  %v426_v18 = vld [vmem:[#allocation7 + $0x108] sm:$0xff] }
  0x57   :  { %1006 = vmatpush1.bf16.msra.mxu0 %v1005_v24  ;;  %v1053_v14 = vpack.c.bf16 %v421_v12, %v417_v11  ;;  %v1181_v17 = vpack.c.bf16 %v423_v16, %v419_v15  ;;  %v430_v19 = vld [vmem:[#allocation7 + $0x128] sm:$0xff]  ;;  %v428_v20 = vld [vmem:[#allocation7 + $0x118] sm:$0xff]  ;;  %v425_v23 = vld [vmem:[#allocation7 + $0x100] sm:$0xff] }
  0x58   :  { %1040 = vmatprep.subr.bf16.mxu0 %v1039_v30  ;;  %v1055_v21 = vpack.c.bf16 %v430_v19, %v426_v18  ;;  %v432_v22 = vld [vmem:[#allocation7 + $0x138] sm:$0xff]  ;;  %v429_v24 = vld [vmem:[#allocation7 + $0x120] sm:$0xff]  ;;  %v427_v27 = vld [vmem:[#allocation7 + $0x110] sm:$0xff] }
  0x59   :  { %1038 = vmatpush1.bf16.msra.mxu1 %v1037_v48  ;;  %v1183_v25 = vpack.c.bf16 %v432_v22, %v428_v20  ;;  %v1057_v26 = vpack.c.bf16 %v429_v24, %v425_v23  ;;  %v431_v28 = vld [vmem:[#allocation7 + $0x130] sm:$0xff]  ;;  %v434_v30 = vld [vmem:[#allocation7 + $0x148] sm:$0xff]  ;;  %v436_v32 = vld [vmem:[#allocation7 + $0x158] sm:$0xff] }
  0x5a   :  { %212 = vmatmul.mubr.f32.vlgmr.msra.gmra.mrb[0].mxu0 %v60_v35  ;;  %1168 = vmatprep.subr.bf16.mxu1 %v1167_v49  ;;  %v1185_v29 = vpack.c.bf16 %v431_v28, %v427_v27  ;;  %v438_v31 = vld [vmem:[#allocation7 + $0x168] sm:$0xff]  ;;  %v440_v34 = vld [vmem:[#allocation7 + $0x178] sm:$0xff]  ;;  %v437_v36 = vld [vmem:[#allocation7 + $0x160] sm:$0xff] }
  0x5b   :  { %1042 = vmatpush1.bf16.msra.mxu0 %v1041_v41  ;;  %v1059_v33 = vpack.c.bf16 %v438_v31, %v434_v30  ;;  %v1187_v37 = vpack.c.bf16 %v440_v34, %v436_v32  ;;  %v435_v39 = vld [vmem:[#allocation7 + $0x150] sm:$0xff]  ;;  %v442_v42 = vld [vmem:[#allocation7 + $0x188] sm:$0xff]  ;;  %v444_v44 = vld [vmem:[#allocation7 + $0x198] sm:$0xff] }
  0x5c   :  { %1044 = vmatprep.subr.bf16.mxu0 %v1043_v43  ;;  %283 = vmatmul.mubr.f32.vlgmr.msra.gmra.mrb[0].mxu1 %v60_v35  ;;  %v433_v35 = vld [vmem:[#allocation7 + $0x140] sm:$0xff]  ;;  %v439_v40 = vld [vmem:[#allocation7 + $0x170] sm:$0xff]  ;;  %v446_v43 = vld [vmem:[#allocation7 + $0x1a8] sm:$0xff] }
  0x5d   :  { %1170 = vmatpush1.bf16.msra.mxu1 %v1169_v58  ;;  %v1061_v38 = vpack.c.bf16 %v437_v36, %v433_v35  ;;  %v1189_v41 = vpack.c.bf16 %v439_v40, %v435_v39  ;;  %v1063_v45 = vpack.c.bf16 %v446_v43, %v442_v42  ;;  %v448_v46 = vld [vmem:[#allocation7 + $0x1b8] sm:$0xff]  ;;  %v441_v47 = vld [vmem:[#allocation7 + $0x180] sm:$0xff]  ;;  %v443_v51 = vld [vmem:[#allocation7 + $0x190] sm:$0xff] }
  0x5e   :  { %1172 = vmatprep.subr.bf16.mxu1 %v1171_v59  ;;  %v445_v48 = vld [vmem:[#allocation7 + $0x1a0] sm:$0xff]  ;;  %v1191_v49 = vpack.c.bf16 %v448_v46, %v444_v44  ;;  %v447_v52 = vld [vmem:[#allocation7 + $0x1b0] sm:$0xff]  ;;  %v450_v54 = vld [vmem:[#allocation7 + $0x1c8] sm:$0xff] }
  0x5f   :  { %1046 = vmatpush1.bf16.msra.mxu0 %v1045_v53  ;;  %v1065_v50 = vpack.c.bf16 %v445_v48, %v441_v47  ;;  %v1193_v53 = vpack.c.bf16 %v447_v52, %v443_v51  ;;  %v452_v56 = vld [vmem:[#allocation7 + $0x1d8] sm:$0xff]  ;;  %v449_v59 = vld [vmem:[#allocation7 + $0x1c0] sm:$0xff]  ;;  %v451_v63 = vld [vmem:[#allocation7 + $0x1d0] sm:$0xff] }
  0x60   :  { %1048 = vmatprep.subr.bf16.mxu0 %v1047_v55  ;;  %v454_v55 = vld [vmem:[#allocation7 + $0x1e8] sm:$0xff]  ;;  %v456_v58 = vld [vmem:[#allocation7 + $0x1f8] sm:$0xff]  ;;  %v453_v60 = vld [vmem:[#allocation7 + $0x1e0] sm:$0xff] }
  0x61   :  { %1174 = vmatpush1.bf16.msra.mxu1 %v1173_v1  ;;  %v1067_v57 = vpack.c.bf16 %v454_v55, %v450_v54  ;;  %v1195_v61 = vpack.c.bf16 %v456_v58, %v452_v56  ;;  %v455_v0 = vld [vmem:[#allocation7 + $0x1f0] sm:$0xff]  ;;  %v462_v3 = vld [vmem:[#allocation7 + $0x228] sm:$0xff]  ;;  %v460_v4 = vld [vmem:[#allocation7 + $0x218] sm:$0xff] }
  0x62   :  { %1176 = vmatprep.subr.bf16.mxu1 %v1175_v2  ;;  %v1197_v1 = vpack.c.bf16 %v455_v0, %v451_v63  ;;  %v458_v2 = vld [vmem:[#allocation7 + $0x208] sm:$0xff]  ;;  %v464_v6 = vld [vmem:[#allocation7 + $0x238] sm:$0xff]  ;;  %v457_v7 = vld [vmem:[#allocation7 + $0x200] sm:$0xff] }
  0x63   :  { %1050 = vmatpush1.bf16.msra.mxu0 %v1049_v62  ;;  %v1069_v62 = vpack.c.bf16 %v453_v60, %v449_v59  ;;  %v461_v8 = vld [vmem:[#allocation7 + $0x220] sm:$0xff]  ;;  %v459_v11 = vld [vmem:[#allocation7 + $0x210] sm:$0xff]  ;;  %v470_v15 = vld [vmem:[#allocation7 + $0x268] sm:$0xff] }
  0x64   :  { %1052 = vmatprep.subr.bf16.mxu0 %v1051_v9  ;;  %v1199_v9 = vpack.c.bf16 %v464_v6, %v460_v4  ;;  %v1073_v10 = vpack.c.bf16 %v461_v8, %v457_v7  ;;  %v463_v12 = vld [vmem:[#allocation7 + $0x230] sm:$0xff]  ;;  %v468_v16 = vld [vmem:[#allocation7 + $0x258] sm:$0xff]  ;;  %v465_v19 = vld [vmem:[#allocation7 + $0x240] sm:$0xff] }
  0x65   :  { %1178 = vmatpush1.bf16.msra.mxu1 %v1177_v5  ;;  %v1071_v5 = vpack.c.bf16 %v462_v3, %v458_v2  ;;  %v472_v18 = vld [vmem:[#allocation7 + $0x278] sm:$0xff]  ;;  %v469_v20 = vld [vmem:[#allocation7 + $0x260] sm:$0xff]  ;;  %v467_v23 = vld [vmem:[#allocation7 + $0x250] sm:$0xff] }
  0x66   :  { %1180 = vmatprep.subr.bf16.mxu1 %v1179_v13  ;;  %v1201_v13 = vpack.c.bf16 %v463_v12, %v459_v11  ;;  %v1077_v22 = vpack.c.bf16 %v469_v20, %v465_v19  ;;  %v471_v24 = vld [vmem:[#allocation7 + $0x270] sm:$0xff]  ;;  %v478_v27 = vld [vmem:[#allocation7 + $0x2a8] sm:$0xff]  ;;  %v476_v28 = vld [vmem:[#allocation7 + $0x298] sm:$0xff] }
  0x67   :  { %1054 = vmatpush1.bf16.msra.mxu0 %v1053_v14  ;;  %v466_v14 = vld [vmem:[#allocation7 + $0x248] sm:$0xff]  ;;  %v480_v30 = vld [vmem:[#allocation7 + $0x2b8] sm:$0xff]  ;;  %v473_v31 = vld [vmem:[#allocation7 + $0x280] sm:$0xff] }
  0x68   :  { %1056 = vmatprep.subr.bf16.mxu0 %v1055_v21  ;;  %v1203_v21 = vpack.c.bf16 %v472_v18, %v468_v16  ;;  %v477_v32 = vld [vmem:[#allocation7 + $0x2a0] sm:$0xff]  ;;  %v475_v35 = vld [vmem:[#allocation7 + $0x290] sm:$0xff]  ;;  %v486_v39 = vld [vmem:[#allocation7 + $0x2e8] sm:$0xff] }
  0x69   :  { %1182 = vmatpush1.bf16.msra.mxu1 %v1181_v17  ;;  %v1075_v17 = vpack.c.bf16 %v470_v15, %v466_v14  ;;  %v1081_v34 = vpack.c.bf16 %v477_v32, %v473_v31  ;;  %v479_v36 = vld [vmem:[#allocation7 + $0x2b0] sm:$0xff]  ;;  %v484_v40 = vld [vmem:[#allocation7 + $0x2d8] sm:$0xff]  ;;  %v481_v43 = vld [vmem:[#allocation7 + $0x2c0] sm:$0xff] }
  0x6a   :  { %1184 = vmatprep.subr.bf16.mxu1 %v1183_v25  ;;  %v1205_v25 = vpack.c.bf16 %v471_v24, %v467_v23  ;;  %v488_v42 = vld [vmem:[#allocation7 + $0x2f8] sm:$0xff]  ;;  %v485_v44 = vld [vmem:[#allocation7 + $0x2e0] sm:$0xff]  ;;  %v483_v47 = vld [vmem:[#allocation7 + $0x2d0] sm:$0xff] }
  0x6b   :  { %1058 = vmatpush1.bf16.msra.mxu0 %v1057_v26  ;;  %v474_v26 = vld [vmem:[#allocation7 + $0x288] sm:$0xff]  ;;  %v1085_v46 = vpack.c.bf16 %v485_v44, %v481_v43  ;;  %v487_v48 = vld [vmem:[#allocation7 + $0x2f0] sm:$0xff]  ;;  %v492_v52 = vld [vmem:[#allocation7 + $0x318] sm:$0xff] }
  0x6c   :  { %1060 = vmatprep.subr.bf16.mxu0 %v1059_v33  ;;  %v1207_v33 = vpack.c.bf16 %v480_v30, %v476_v28  ;;  %v494_v51 = vld [vmem:[#allocation7 + $0x328] sm:$0xff]  ;;  %v496_v54 = vld [vmem:[#allocation7 + $0x338] sm:$0xff]  ;;  %v489_v55 = vld [vmem:[#allocation7 + $0x300] sm:$0xff] }
  0x6d   :  { %1186 = vmatpush1.bf16.msra.mxu1 %v1185_v29  ;;  %v1079_v29 = vpack.c.bf16 %v478_v27, %v474_v26  ;;  %v493_v56 = vld [vmem:[#allocation7 + $0x320] sm:$0xff]  ;;  %v491_v59 = vld [vmem:[#allocation7 + $0x310] sm:$0xff]  ;;  %v502_v63 = vld [vmem:[#allocation7 + $0x368] sm:$0xff] }
  0x6e   :  { %1188 = vmatprep.subr.bf16.mxu1 %v1187_v37  ;;  %v1209_v37 = vpack.c.bf16 %v479_v36, %v475_v35  ;;  %v1089_v58 = vpack.c.bf16 %v493_v56, %v489_v55  ;;  %v495_v60 = vld [vmem:[#allocation7 + $0x330] sm:$0xff]  ;;  %v500_v0 = vld [vmem:[#allocation7 + $0x358] sm:$0xff]  ;;  %v497_v3 = vld [vmem:[#allocation7 + $0x340] sm:$0xff] }
  0x6f   :  { %1062 = vmatpush1.bf16.msra.mxu0 %v1061_v38  ;;  %v482_v38 = vld [vmem:[#allocation7 + $0x2c8] sm:$0xff]  ;;  %v504_v2 = vld [vmem:[#allocation7 + $0x378] sm:$0xff]  ;;  %v501_v4 = vld [vmem:[#allocation7 + $0x360] sm:$0xff] }
  0x70   :  { %1064 = vmatprep.subr.bf16.mxu0 %v1063_v45  ;;  %v1211_v45 = vpack.c.bf16 %v488_v42, %v484_v40  ;;  %v1093_v6 = vpack.c.bf16 %v501_v4, %v497_v3  ;;  %v499_v7 = vld [vmem:[#allocation7 + $0x350] sm:$0xff]  ;;  %v510_v11 = vld [vmem:[#allocation7 + $0x3a8] sm:$0xff]  ;;  %v508_v12 = vld [vmem:[#allocation7 + $0x398] sm:$0xff]  ;;  %v127_v40 = vlaneseq }
  0x71   :  { %1190 = vmatpush1.bf16.msra.mxu1 %v1189_v41  ;;  %v1083_v41 = vpack.c.bf16 %v486_v39, %v482_v38  ;;  %v503_v8 = vld [vmem:[#allocation7 + $0x370] sm:$0xff]  ;;  %v512_v14 = vld [vmem:[#allocation7 + $0x3b8] sm:$0xff]  ;;  %v505_v15 = vld [vmem:[#allocation7 + $0x380] sm:$0xff] }
  0x72   :  { %1192 = vmatprep.subr.bf16.mxu1 %v1191_v49  ;;  %v1213_v49 = vpack.c.bf16 %v487_v48, %v483_v47  ;;  %v509_v16 = vld [vmem:[#allocation7 + $0x3a0] sm:$0xff]  ;;  %v507_v19 = vld [vmem:[#allocation7 + $0x390] sm:$0xff]  ;;  %v518_v23 = vld [vmem:[#allocation7 + $0x3e8] sm:$0xff] }
  0x73   :  { %1066 = vmatpush1.bf16.msra.mxu0 %v1065_v50  ;;  %v490_v50 = vld [vmem:[#allocation7 + $0x308] sm:$0xff]  ;;  %v1097_v18 = vpack.c.bf16 %v509_v16, %v505_v15  ;;  %v511_v20 = vld [vmem:[#allocation7 + $0x3b0] sm:$0xff]  ;;  %v516_v24 = vld [vmem:[#allocation7 + $0x3d8] sm:$0xff] }
  0x74   :  { %1068 = vmatprep.subr.bf16.mxu0 %v1067_v57  ;;  %v1215_v57 = vpack.c.bf16 %v496_v54, %v492_v52  ;;  %v520_v26 = vld [vmem:[#allocation7 + $0x3f8] sm:$0xff]  ;;  %v513_v27 = vld [vmem:[#allocation7 + $0x3c0] sm:$0xff]  ;;  %v515_v31 = vld [vmem:[#allocation7 + $0x3d0] sm:$0xff] }
  0x75   :  { %1194 = vmatpush1.bf16.msra.mxu1 %v1193_v53  ;;  %v1087_v53 = vpack.c.bf16 %v494_v51, %v490_v50  ;;  %v517_v28 = vld [vmem:[#allocation7 + $0x3e0] sm:$0xff]  ;;  %v519_v32 = vld [vmem:[#allocation7 + $0x3f0] sm:$0xff]  ;;  %v526_v35 = vld [vmem:[#allocation7 + $0x428] sm:$0xff] }
  0x76   :  { %1196 = vmatprep.subr.bf16.mxu1 %v1195_v61  ;;  %v1217_v61 = vpack.c.bf16 %v495_v60, %v491_v59  ;;  %v1101_v30 = vpack.c.bf16 %v517_v28, %v513_v27  ;;  %v524_v36 = vld [vmem:[#allocation7 + $0x418] sm:$0xff] }
  0x77   :  { %1070 = vmatpush1.bf16.msra.mxu0 %v1069_v62  ;;  %v498_v62 = vld [vmem:[#allocation7 + $0x348] sm:$0xff]  ;;  %v528_v38 = vld [vmem:[#allocation7 + $0x438] sm:$0xff] }
  0x78   :  { %1072 = vmatprep.subr.bf16.mxu0 %v1071_v5  ;;  %v1219_v5 = vpack.c.bf16 %v504_v2, %v500_v0  ;;  %v1231_v39 = vpack.c.bf16 %v528_v38, %v524_v36  ;;  %v125_v43 = vld [vmem:[%s1587_s2] sm:$0xf] }
  0x79   :  { %1198 = vmatpush1.bf16.msra.mxu1 %v1197_v1  ;;  %v1091_v1 = vpack.c.bf16 %v502_v63, %v498_v62 }
  0x7a   :  { %1200 = vmatprep.subr.bf16.mxu1 %v1199_v9  ;;  %v1221_v9 = vpack.c.bf16 %v503_v8, %v499_v7 }
  0x7b   :  { %1074 = vmatpush1.bf16.msra.mxu0 %v1073_v10  ;;  %v506_v10 = vld [vmem:[#allocation7 + $0x388] sm:$0xff] }
  0x7c   :  { %1076 = vmatprep.subr.bf16.mxu0 %v1075_v17  ;;  %v1223_v17 = vpack.c.bf16 %v512_v14, %v508_v12 }
  0x7d   :  { %1202 = vmatpush1.bf16.msra.mxu1 %v1201_v13  ;;  %v1095_v13 = vpack.c.bf16 %v510_v11, %v506_v10 }
  0x7e   :  { %1204 = vmatprep.subr.bf16.mxu1 %v1203_v21  ;;  %v1225_v21 = vpack.c.bf16 %v511_v20, %v507_v19 }
  0x7f   :  { %1078 = vmatpush1.bf16.msra.mxu0 %v1077_v22  ;;  %v514_v22 = vld [vmem:[#allocation7 + $0x3c8] sm:$0xff] }
  0x80   :  { %1080 = vmatprep.subr.bf16.mxu0 %v1079_v29  ;;  %v1227_v29 = vpack.c.bf16 %v520_v26, %v516_v24 }
  0x81   :  { %1206 = vmatpush1.bf16.msra.mxu1 %v1205_v25  ;;  %v1099_v25 = vpack.c.bf16 %v518_v23, %v514_v22 }
  0x82   :  { %1208 = vmatprep.subr.bf16.mxu1 %v1207_v33  ;;  %v1229_v33 = vpack.c.bf16 %v519_v32, %v515_v31 }
  0x83   :  { %1082 = vmatpush1.bf16.msra.mxu0 %v1081_v34  ;;  %v522_v34 = vld [vmem:[#allocation7 + $0x408] sm:$0xff] }
  0x84   :  { %1084 = vmatprep.subr.bf16.mxu0 %v1083_v41  ;;  %v1499_v41 = vshrl.u32 %v127_v40, 7 }
  0x85   :  { %1210 = vmatpush1.bf16.msra.mxu1 %v1209_v37  ;;  %v1103_v37 = vpack.c.bf16 %v526_v35, %v522_v34 }
  0x86   :  { %1212 = vmatprep.subr.bf16.mxu1 %v1211_v45  ;;  %v129_v42 = vsub.s32 0, %v1499_v41  ;;  %v133_v44 = vsub.s32 1, %v1499_v41  ;;  %v141_v50 = vsub.s32 3, %v1499_v41 }
  0x87   :  { %1086 = vmatpush1.bf16.msra.mxu0 %v1085_v46 }
  0x88   :  { %1088 = vmatprep.subr.bf16.mxu0 %v1087_v53  ;;  %v130_v45 = vrot.slane %v125_v43, %v129_v42  ;;  %v134_v46 = vrot.slane %v125_v43, %v133_v44  ;;  %v142_v55 = vrot.slane %v125_v43, %v141_v50 }
  0x89   :  { %1214 = vmatpush1.bf16.msra.mxu1 %v1213_v49 }
  0x8a   :  { %1216 = vmatprep.subr.bf16.mxu1 %v1215_v57 }
  0x8b   :  { %1090 = vmatpush1.bf16.msra.mxu0 %v1089_v58 }
  0x8c   :  { %1092 = vmatprep.subr.bf16.mxu0 %v1091_v1 }
  0x8d   :  { %1218 = vmatpush1.bf16.msra.mxu1 %v1217_v61 }
  0x8e   :  { %1220 = vmatprep.subr.bf16.mxu1 %v1219_v5 }
  0x8f   :  { %1094 = vmatpush1.bf16.msra.mxu0 %v1093_v6  ;;  %v137_v6 = vsub.s32 2, %v1499_v41 }
  0x90   :  { %1096 = vmatprep.subr.bf16.mxu0 %v1095_v13 }
  0x91   :  { %1222 = vmatpush1.bf16.msra.mxu1 %v1221_v9  ;;  %v138_v12 = vrot.slane %v125_v43, %v137_v6 }
  0x92   :  { %1224 = vmatprep.subr.bf16.mxu1 %v1223_v17 }
  0x93   :  { %1098 = vmatpush1.bf16.msra.mxu0 %v1097_v18 }
  0x94   :  { %1100 = vmatprep.subr.bf16.mxu0 %v1099_v25 }
  0x95   :  { %1226 = vmatpush1.bf16.msra.mxu1 %v1225_v21 }
  0x96   :  { %1228 = vmatprep.subr.bf16.mxu1 %v1227_v29 }
  0x97   :  { %1102 = vmatpush1.bf16.msra.mxu0 %v1101_v30 }
  0x98   :  { %1104 = vmatprep.subr.bf16.mxu0 %v1103_v37 }
  0x99   :  { %1230 = vmatpush1.bf16.msra.mxu1 %v1229_v33 }
  0x9a   :  { %1232 = vmatprep.subr.bf16.mxu1 %v1231_v39 }
 0x12d   :  { %v213_v47 = vpop.f32.mrb[0].mxu0 }
 0x12e   :  { %v1510_v48 = vadd.f32 %v213_v47, %v130_v45  ;;  %v215_v49 = vpop.f32.mrb[1].mxu0 }
 0x12f   :  { %v1513_v51 = vadd.f32 %v215_v49, %v134_v46  ;;  %v284_v58 = vpop.f32.mrb[0].mxu1 }
 0x130   :  { %v1516_v52 = vmul.f32 0.70710677, %v1510_v48  ;;  %v286_v60 = vpop.f32.mrb[1].mxu1  ;;  %v1534_v20 = vadd.f32 %v284_v58, %v138_v12  ;;  %v527_v12 = vld [vmem:[#allocation7 + $0x430] sm:$0xff] }
 0x131   :  { %v1519_v53 = vmul.f32 0.70710677, %v1513_v51  ;;  %v1525_v62 = vadd.f32 %v286_v60, %v142_v55 }
 0x132   :  { %v297_v54 = vand.u32 2147483647, %v1516_v52  ;;  %v1537_v28 = vmul.f32 0.70710677, %v1534_v20  ;;  %vm373_vm0 = vcmp.ge.f32.partialorder %v1516_v52, 0.0 }
 0x133   :  { %v298_v56 = vand.u32 2147483647, %v1519_v53  ;;  %v1528_v0 = vmul.f32 0.70710677, %v1525_v62  ;;  %vm374_vm1 = vcmp.ge.f32.partialorder %v1519_v53, 0.0 }
 0x134   :  { %v301_v57 = vmul.f32 0.3275911, %v297_v54  ;;  %v349_v3 = vsub.f32 0.0, %v297_v54  ;;  %v1540_v36 = vand.u32 2147483647, %v1537_v28  ;;  %vm375_vm3 = vcmp.ge.f32.partialorder %v1537_v28, 0.0 }
 0x135   :  { %v302_v59 = vmul.f32 0.3275911, %v298_v56  ;;  %v300_v1 = vand.u32 2147483647, %v1528_v0  ;;  %v350_v5 = vsub.f32 0.0, %v298_v56  ;;  %vm376_vm2 = vcmp.ge.f32.partialorder %v1528_v0, 0.0 }
 0x136   :  { %v305_v61 = vadd.f32 1.0, %v301_v57  ;;  %v353_v8 = vmul.f32 %v349_v3, %v297_v54  ;;  %v303_v47 = vmul.f32 0.3275911, %v1540_v36  ;;  %v545_v0 = vld [vmem:[#allocation7 + $0x4c0] sm:$0xff] }
 0x137   :  { %v306_v63 = vadd.f32 1.0, %v302_v59  ;;  %v304_v2 = vmul.f32 0.3275911, %v300_v1  ;;  %v354_v11 = vmul.f32 %v350_v5, %v298_v56  ;;  %v352_v13 = vsub.f32 0.0, %v300_v1  ;;  %v521_v5 = vld [vmem:[#allocation7 + $0x400] sm:$0xff] }
 0x138   :  { %1310 = vrcp.f32 %v305_v61  ;;  %v357_v16 = vmul.f32 1.442695, %v353_v8  ;;  %v307_v60 = vadd.f32 1.0, %v303_v47  ;;  %v539_v47 = vld [vmem:[#allocation7 + $0x490] sm:$0xff] }
 0x139   :  { %1312 = vrcp.f32 %v306_v63  ;;  %v308_v4 = vadd.f32 1.0, %v304_v2  ;;  %v359_v19 = vmul.f32 1.442695, %v354_v11  ;;  %v356_v21 = vmul.f32 %v352_v13, %v300_v1  ;;  %v523_v11 = vld [vmem:[#allocation7 + $0x410] sm:$0xff]  ;;  %v530_v13 = vld [vmem:[#allocation7 + $0x448] sm:$0xff] }
 0x13b   :  { %1314 = vrcp.f32 %v308_v4  ;;  %v363_v29 = vmul.f32 1.442695, %v356_v21 }
 0x13c   :  { %1316 = vpow2.f32 %v357_v16  ;;  %v534_v16 = vld [vmem:[#allocation7 + $0x468] sm:$0xff] }
 0x13d   :  { %1318 = vpow2.f32 %v359_v19  ;;  %v289_v19 = vmul.f32 0.5, %v1510_v48 }
 0x13e   :  { %1320 = vpow2.f32 %v363_v29 }
 0x13f   :  { %1322 = vrcp.f32 %v307_v60 }
 0x142   :  { %v1311_v7 = vpop.eup %1310 }
 0x143   :  { %v1313_v9 = vpop.eup %1312  ;;  %v313_v10 = vmul.f32 1.0614054, %v1311_v7 }
 0x144   :  { %v314_v14 = vmul.f32 1.0614054, %v1313_v9 }
 0x145   :  { %v317_v15 = vadd.f32 -1.4531521, %v313_v10  ;;  %v1315_v24 = vpop.eup %1314 }
 0x146   :  { %v318_v17 = vadd.f32 -1.4531521, %v314_v14  ;;  %v316_v27 = vmul.f32 1.0614054, %v1315_v24  ;;  %v1317_v46 = vpop.eup %1316  ;;  %v290_v14 = vmul.f32 0.5, %v1513_v51  ;;  %v535_v51 = vld [vmem:[#allocation7 + $0x470] sm:$0xff] }
 0x147   :  { %v321_v18 = vmul.f32 %v1311_v7, %v317_v15  ;;  %v1319_v54 = vpop.eup %1318 }
 0x148   :  { %v322_v22 = vmul.f32 %v1313_v9, %v318_v17  ;;  %v320_v32 = vadd.f32 -1.4531521, %v316_v27  ;;  %v1321_v2 = vpop.eup %1320  ;;  %v532_v17 = vld [vmem:[#allocation7 + $0x458] sm:$0xff]  ;;  %v1107_v27 = vpack.c.bf16 %v534_v16, %v530_v13  ;;  %v553_v13 = vld [vmem:[#allocation7 + $0x500] sm:$0xff] }
 0x149   :  { %v325_v23 = vadd.f32 1.4214138, %v321_v18  ;;  %v536_v18 = vld [vmem:[#allocation7 + $0x478] sm:$0xff] }
 0x14a   :  { %v326_v25 = vadd.f32 1.4214138, %v322_v22  ;;  %v324_v35 = vmul.f32 %v1315_v24, %v320_v32  ;;  %v1233_v22 = vpack.c.bf16 %v527_v12, %v523_v11  ;;  %v1235_v29 = vpack.c.bf16 %v536_v18, %v532_v17  ;;  %v542_v32 = vld [vmem:[#allocation7 + $0x4a8] sm:$0xff]  ;;  %v555_v17 = vld [vmem:[#allocation7 + $0x510] sm:$0xff] }
 0x14b   :  { %v329_v26 = vmul.f32 %v1311_v7, %v325_v23  ;;  %v529_v23 = vld [vmem:[#allocation7 + $0x440] sm:$0xff]  ;;  %v559_v18 = vld [vmem:[#allocation7 + $0x530] sm:$0xff] }
 0x14c   :  { %v330_v30 = vmul.f32 %v1313_v9, %v326_v25  ;;  %v328_v39 = vadd.f32 1.4214138, %v324_v35  ;;  %v292_v35 = vmul.f32 0.5, %v1525_v62  ;;  %v550_v62 = vld [vmem:[#allocation7 + $0x4e8] sm:$0xff] }
 0x14d   :  { %v333_v31 = vadd.f32 -0.28449672, %v329_v26 }
 0x14e   :  { %v334_v33 = vadd.f32 -0.28449672, %v330_v30  ;;  %v332_v45 = vmul.f32 %v1315_v24, %v328_v39  ;;  %v531_v30 = vld [vmem:[#allocation7 + $0x450] sm:$0xff]  ;;  %v537_v39 = vld [vmem:[#allocation7 + $0x480] sm:$0xff] }
 0x14f   :  { %v337_v34 = vmul.f32 %v1311_v7, %v333_v31  ;;  %v538_v31 = vld [vmem:[#allocation7 + $0x488] sm:$0xff] }
 0x150   :  { %v338_v37 = vmul.f32 %v1313_v9, %v334_v33  ;;  %v336_v56 = vadd.f32 -0.28449672, %v332_v45  ;;  %v540_v33 = vld [vmem:[#allocation7 + $0x498] sm:$0xff]  ;;  %v1111_v45 = vpack.c.bf16 %v542_v32, %v538_v31  ;;  %v570_v31 = vld [vmem:[#allocation7 + $0x588] sm:$0xff] }
 0x151   :  { %v341_v38 = vadd.f32 0.2548296, %v337_v34  ;;  %v544_v34 = vld [vmem:[#allocation7 + $0x4b8] sm:$0xff] }
 0x152   :  { %v342_v40 = vadd.f32 0.2548296, %v338_v37  ;;  %v340_v59 = vmul.f32 %v1315_v24, %v336_v56  ;;  %v548_v56 = vld [vmem:[#allocation7 + $0x4d8] sm:$0xff] }
 0x153   :  { %v345_v43 = vmul.f32 %v1311_v7, %v341_v38  ;;  %v525_v7 = vld [vmem:[#allocation7 + $0x420] sm:$0xff]  ;;  %v1237_v38 = vpack.c.bf16 %v535_v51, %v531_v30  ;;  %v563_v30 = vld [vmem:[#allocation7 + $0x550] sm:$0xff] }
 0x154   :  { %v346_v49 = vmul.f32 %v1313_v9, %v342_v40  ;;  %v344_v1 = vadd.f32 0.2548296, %v340_v59  ;;  %v1105_v53 = vpack.c.bf16 %v525_v7, %v521_v5  ;;  %v541_v40 = vld [vmem:[#allocation7 + $0x4a0] sm:$0xff]  ;;  %v554_v5 = vld [vmem:[#allocation7 + $0x508] sm:$0xff]  ;;  %v567_v51 = vld [vmem:[#allocation7 + $0x570] sm:$0xff] }
 0x155   :  { %v365_v55 = vmul.f32 %v1317_v46, %v345_v43  ;;  %v1239_v46 = vpack.c.bf16 %v544_v34, %v540_v33  ;;  %v1113_v60 = vpack.c.bf16 %v541_v40, %v537_v39  ;;  %v574_v33 = vld [vmem:[#allocation7 + $0x5a8] sm:$0xff]  ;;  %v572_v34 = vld [vmem:[#allocation7 + $0x598] sm:$0xff]  ;;  %v573_v39 = vld [vmem:[#allocation7 + $0x5a0] sm:$0xff]  ;;  %v351_v40 = vsub.f32 0.0, %v1540_v36 }
 0x156   :  { %v366_v57 = vmul.f32 %v1319_v54, %v346_v49  ;;  %v348_v8 = vmul.f32 %v1315_v24, %v344_v1  ;;  %v533_v24 = vld [vmem:[#allocation7 + $0x460] sm:$0xff]  ;;  %v543_v49 = vld [vmem:[#allocation7 + $0x4b0] sm:$0xff]  ;;  %v546_v54 = vld [vmem:[#allocation7 + $0x4c8] sm:$0xff] }
 0x157   :  { %v369_v58 = vsub.f32 1.0, %v365_v55  ;;  %v1109_v37 = vpack.c.bf16 %v533_v24, %v529_v23  ;;  %v1115_v1 = vpack.c.bf16 %v550_v62, %v546_v54  ;;  %v1249_v24 = vpack.c.bf16 %v559_v18, %v555_v17  ;;  %v580_v62 = vld [vmem:[#allocation7 + $0x5d8] sm:$0xff]  ;;  %v591_v17 = vld [vmem:[#allocation7 + $0x630] sm:$0xff]  ;;  %v594_v18 = vld [vmem:[#allocation7 + $0x648] sm:$0xff] }
 0x158   :  { %v370_v61 = vsub.f32 1.0, %v366_v57  ;;  %v368_v52 = vmul.f32 %v1321_v2, %v348_v8  ;;  %v552_v57 = vld [vmem:[#allocation7 + $0x4f8] sm:$0xff]  ;;  %v558_v8 = vld [vmem:[#allocation7 + $0x528] sm:$0xff] }
 0x159   :  { %v377_v63 = vsub.f32 0.0, %v369_v58  ;;  %v1243_v2 = vpack.c.bf16 %v552_v57, %v548_v56  ;;  %v584_v56 = vld [vmem:[#allocation7 + $0x5f8] sm:$0xff] }
 0x15a   :  { %v378_v3 = vsub.f32 0.0, %v370_v61  ;;  %v372_v25 = vsub.f32 1.0, %v368_v52  ;;  %v562_v52 = vld [vmem:[#allocation7 + $0x548] sm:$0xff] }
 0x15b   :  { %v381_v4 = vsel %vm373_vm0, %v369_v58, %v377_v63  ;;  %v1551_v58 = vpop.eup %1322  ;;  %v549_v63 = vld [vmem:[#allocation7 + $0x4e0] sm:$0xff] }
 0x15c   :  { %v385_v9 = vadd.f32 1.0, %v381_v4  ;;  %v382_v10 = vsel %vm374_vm1, %v370_v61, %v378_v3  ;;  %v380_v48 = vsub.f32 0.0, %v372_v25  ;;  %v1241_v61 = vpack.c.bf16 %v543_v49, %v539_v47  ;;  %v547_v3 = vld [vmem:[#allocation7 + $0x4d0] sm:$0xff]  ;;  %v578_v49 = vld [vmem:[#allocation7 + $0x5c8] sm:$0xff] }
 0x15d   :  { %v386_v15 = vadd.f32 1.0, %v382_v10  ;;  %v551_v4 = vld [vmem:[#allocation7 + $0x4f0] sm:$0xff]  ;;  %v315_v7 = vmul.f32 1.0614054, %v1551_v58  ;;  %v560_v10 = vld [vmem:[#allocation7 + $0x538] sm:$0xff]  ;;  %v1117_v11 = vpack.c.bf16 %v549_v63, %v545_v0  ;;  %v355_v0 = vmul.f32 %v351_v40, %v1540_v36 }
 0x15e   :  { %v389_v26 = vmul.f32 %v385_v9, %v289_v19  ;;  %v384_v43 = vsel %vm376_vm2, %v372_v25, %v380_v48  ;;  %v556_v9 = vld [vmem:[#allocation7 + $0x518] sm:$0xff]  ;;  %v1245_v12 = vpack.c.bf16 %v551_v4, %v547_v3  ;;  %v561_v25 = vld [vmem:[#allocation7 + $0x540] sm:$0xff]  ;;  %v575_v47 = vld [vmem:[#allocation7 + $0x5b0] sm:$0xff] }
 0x15f   :  { %v390_v21 = vmul.f32 %v386_v15, %v290_v14  ;;  %v388_v55 = vadd.f32 1.0, %v384_v43  ;;  %v557_v14 = vld [vmem:[#allocation7 + $0x520] sm:$0xff]  ;;  %v1119_v15 = vpack.c.bf16 %v558_v8, %v554_v5  ;;  %v1247_v16 = vpack.c.bf16 %v560_v10, %v556_v9  ;;  %v576_v48 = vld [vmem:[#allocation7 + $0x5b8] sm:$0xff]  ;;  %v583_v3 = vld [vmem:[#allocation7 + $0x5f0] sm:$0xff] }
 0x160   :  { %v319_v19 = vadd.f32 -1.4531521, %v315_v7  ;;  %v1121_v23 = vpack.c.bf16 %v557_v14, %v553_v13  ;;  %v1127_v43 = vpack.c.bf16 %v574_v33, %v570_v31  ;;  %v586_v4 = vld [vmem:[#allocation7 + $0x608] sm:$0xff]  ;;  %v588_v8 = vld [vmem:[#allocation7 + $0x618] sm:$0xff]  ;;  %v589_v13 = vld [vmem:[#allocation7 + $0x620] sm:$0xff] }
 0x161   :  { %735 = vmatprep.mubr.f32.mxu0 %v390_v21  ;;  %877 = vmatprep.mubr.f32.mxu1 %v390_v21  ;;  %v392_v59 = vmul.f32 %v388_v55, %v292_v35  ;;  %v566_v21 = vld [vmem:[#allocation7 + $0x568] sm:$0xff]  ;;  %v592_v9 = vld [vmem:[#allocation7 + $0x638] sm:$0xff]  ;;  %v361_v14 = vmul.f32 1.442695, %v355_v0  ;;  %v611_v0 = vld [vmem:[#allocation7 + $0x6d0] sm:$0xff] }
 0x162   :  { %736 = vmatmul.mubr.f32.vlgmr.msra.gmra.mrb[2].mxu0 %v389_v26  ;;  %878 = vmatmul.mubr.f32.vlgmr.msra.gmra.mrb[2].mxu1 %v389_v26  ;;  %v565_v26 = vld [vmem:[#allocation7 + $0x560] sm:$0xff]  ;;  %v323_v32 = vmul.f32 %v1551_v58, %v319_v19  ;;  %v582_v55 = vld [vmem:[#allocation7 + $0x5e8] sm:$0xff]  ;;  %v604_v33 = vld [vmem:[#allocation7 + $0x698] sm:$0xff] }
 0x163   :  { %1106 = vmatpush1.bf16.msra.mxu0 %v1105_v53  ;;  %1234 = vmatpush1.bf16.msra.mxu1 %v1233_v22  ;;  %v564_v53 = vld [vmem:[#allocation7 + $0x558] sm:$0xff]  ;;  %v1125_v35 = vpack.c.bf16 %v565_v26, %v561_v25  ;;  %v1131_v63 = vpack.c.bf16 %v582_v55, %v578_v49  ;;  %v590_v7 = vld [vmem:[#allocation7 + $0x628] sm:$0xff]  ;;  %v597_v25 = vld [vmem:[#allocation7 + $0x660] sm:$0xff]  ;;  %1324 = vpow2.f32 %v361_v14 }
 0x164   :  { %1108 = vmatprep.subr.bf16.mxu0 %v1107_v27  ;;  %1236 = vmatprep.subr.bf16.mxu1 %v1235_v29  ;;  %v568_v22 = vld [vmem:[#allocation7 + $0x578] sm:$0xff]  ;;  %v1123_v27 = vpack.c.bf16 %v566_v21, %v562_v52  ;;  %v327_v54 = vadd.f32 1.4214138, %v323_v32  ;;  %v1135_v36 = vpack.c.bf16 %v590_v7, %v586_v4  ;;  %v598_v19 = vld [vmem:[#allocation7 + $0x668] sm:$0xff]  ;;  %v619_v14 = vld [vmem:[#allocation7 + $0x710] sm:$0xff] }
 0x165   :  { %806 = vmatprep.mubr.f32.mxu0 %v392_v59  ;;  %948 = vmatprep.mubr.f32.mxu1 %v392_v59  ;;  %v1251_v29 = vpack.c.bf16 %v568_v22, %v564_v53  ;;  %v596_v21 = vld [vmem:[#allocation7 + $0x658] sm:$0xff]  ;;  %v1139_v26 = vpack.c.bf16 %v598_v19, %v594_v18  ;;  %v606_v32 = vld [vmem:[#allocation7 + $0x6a8] sm:$0xff] }
 0x166   :  { %v331_v5 = vmul.f32 %v1551_v58, %v327_v54  ;;  %v600_v53 = vld [vmem:[#allocation7 + $0x678] sm:$0xff]  ;;  %v614_v49 = vld [vmem:[#allocation7 + $0x6e8] sm:$0xff] }
 0x167   :  { %1110 = vmatpush1.bf16.msra.mxu0 %v1109_v37  ;;  %1238 = vmatpush1.bf16.msra.mxu1 %v1237_v38  ;;  %v1253_v37 = vpack.c.bf16 %v567_v51, %v563_v30  ;;  %v569_v38 = vld [vmem:[#allocation7 + $0x580] sm:$0xff]  ;;  %v599_v30 = vld [vmem:[#allocation7 + $0x670] sm:$0xff]  ;;  %v602_v51 = vld [vmem:[#allocation7 + $0x688] sm:$0xff] }
 0x168   :  { %1112 = vmatprep.subr.bf16.mxu0 %v1111_v45  ;;  %1240 = vmatprep.subr.bf16.mxu1 %v1239_v46  ;;  %v1255_v45 = vpack.c.bf16 %v576_v48, %v572_v34  ;;  %v571_v46 = vld [vmem:[#allocation7 + $0x590] sm:$0xff]  ;;  %v1129_v57 = vpack.c.bf16 %v573_v39, %v569_v38  ;;  %v335_v52 = vadd.f32 -0.28449672, %v331_v5  ;;  %v608_v34 = vld [vmem:[#allocation7 + $0x6b8] sm:$0xff]  ;;  %v605_v38 = vld [vmem:[#allocation7 + $0x6a0] sm:$0xff]  ;;  %v1143_v39 = vpack.c.bf16 %v606_v32, %v602_v51 }
 0x169   :  { %v1257_v59 = vpack.c.bf16 %v575_v47, %v571_v46  ;;  %v1271_v40 = vpack.c.bf16 %v608_v34, %v604_v33  ;;  %v610_v46 = vld [vmem:[#allocation7 + $0x6c8] sm:$0xff]  ;;  %v612_v54 = vld [vmem:[#allocation7 + $0x6d8] sm:$0xff]  ;;  %v633_v33 = vld [vmem:[#allocation7 + $0x780] sm:$0xff] }
 0x16a   :  { %v339_v31 = vmul.f32 %v1551_v58, %v335_v52  ;;  %v616_v55 = vld [vmem:[#allocation7 + $0x6f8] sm:$0xff]  ;;  %v637_v34 = vld [vmem:[#allocation7 + $0x7a0] sm:$0xff] }
 0x16b   :  { %1114 = vmatpush1.bf16.msra.mxu0 %v1113_v60  ;;  %1242 = vmatpush1.bf16.msra.mxu1 %v1241_v61  ;;  %v577_v60 = vld [vmem:[#allocation7 + $0x5c0] sm:$0xff]  ;;  %v620_v4 = vld [vmem:[#allocation7 + $0x718] sm:$0xff] }
 0x16c   :  { %1116 = vmatprep.subr.bf16.mxu0 %v1115_v1  ;;  %1244 = vmatprep.subr.bf16.mxu1 %v1243_v2  ;;  %v581_v61 = vld [vmem:[#allocation7 + $0x5e0] sm:$0xff]  ;;  %v1259_v1 = vpack.c.bf16 %v584_v56, %v580_v62  ;;  %v579_v2 = vld [vmem:[#allocation7 + $0x5d0] sm:$0xff]  ;;  %v343_v47 = vadd.f32 0.2548296, %v339_v31  ;;  %v624_v5 = vld [vmem:[#allocation7 + $0x738] sm:$0xff] }
 0x16d   :  { %v1133_v10 = vpack.c.bf16 %v581_v61, %v577_v60  ;;  %v1147_v60 = vpack.c.bf16 %v614_v49, %v610_v46  ;;  %v1275_v61 = vpack.c.bf16 %v616_v55, %v612_v54  ;;  %v1325_v7 = vpop.eup %1324  ;;  %v632_v18 = vld [vmem:[#allocation7 + $0x778] sm:$0xff]  ;;  %v641_v54 = vld [vmem:[#allocation7 + $0x7c0] sm:$0xff] }
 0x16e   :  { %v640_v51 = vld [vmem:[#allocation7 + $0x7b8] sm:$0xff] }
 0x16f   :  { %1118 = vmatpush1.bf16.msra.mxu0 %v1117_v11  ;;  %1246 = vmatpush1.bf16.msra.mxu1 %v1245_v12  ;;  %v1261_v11 = vpack.c.bf16 %v583_v3, %v579_v2  ;;  %v585_v12 = vld [vmem:[#allocation7 + $0x600] sm:$0xff]  ;;  %v347_v2 = vmul.f32 %v1551_v58, %v343_v47  ;;  %v622_v3 = vld [vmem:[#allocation7 + $0x728] sm:$0xff]  ;;  %v628_v58 = vld [vmem:[#allocation7 + $0x758] sm:$0xff]  ;;  %v1161_v47 = vpack.c.bf16 %v637_v34, %v633_v33 }
 0x170   :  { %1120 = vmatprep.subr.bf16.mxu0 %v1119_v15  ;;  %1248 = vmatprep.subr.bf16.mxu1 %v1247_v16  ;;  %v1263_v15 = vpack.c.bf16 %v592_v9, %v588_v8  ;;  %v587_v16 = vld [vmem:[#allocation7 + $0x610] sm:$0xff]  ;;  %v1137_v22 = vpack.c.bf16 %v589_v13, %v585_v12  ;;  %v1279_v13 = vpack.c.bf16 %v624_v5, %v620_v4  ;;  %v648_v46 = vld [vmem:[#allocation7 + $0x7f8] sm:$0xff] }
 0x173   :  { %1122 = vmatpush1.bf16.msra.mxu0 %v1121_v23  ;;  %1250 = vmatpush1.bf16.msra.mxu1 %v1249_v24  ;;  %v1265_v23 = vpack.c.bf16 %v591_v17, %v587_v16  ;;  %v593_v24 = vld [vmem:[#allocation7 + $0x640] sm:$0xff]  ;;  %v367_v16 = vmul.f32 %v1325_v7, %v347_v2  ;;  %v630_v17 = vld [vmem:[#allocation7 + $0x768] sm:$0xff]  ;;  %v649_v2 = vld [vmem:[%s1589_s4] sm:$0xf]  ;;  %s1392_s4 = scalar_lea.vmem %s966_s7, 512 }
 0x174   :  { %1124 = vmatprep.subr.bf16.mxu0 %v1123_v27  ;;  %1252 = vmatprep.subr.bf16.mxu1 %v1251_v29  ;;  %v1267_v27 = vpack.c.bf16 %v600_v53, %v596_v21  ;;  %v595_v29 = vld [vmem:[#allocation7 + $0x650] sm:$0xff]  ;;  %v1141_v48 = vpack.c.bf16 %v597_v25, %v593_v24  ;;  %v625_v21 = vld [vmem:[#allocation7 + $0x740] sm:$0xff]  ;;  %v662_v4 = vrot.slane %v649_v2, %v137_v6  ;;  %p1393_p10 = scmp.ne.s32.totalorder %s966_s7, %s1392_s4  ;;  %p1398_p12 = scmp.lt.s32.totalorder %s1392_s4, %s1392_s4 }
 0x175   :  { %v629_v53 = vld [vmem:[#allocation7 + $0x760] sm:$0xff]  ;;  %v627_v24 = vld [vmem:[#allocation7 + $0x750] sm:$0xff]  ;;  %v666_v5 = vrot.slane %v649_v2, %v141_v50 }
 0x176   :  { %v631_v25 = vld [vmem:[#allocation7 + $0x770] sm:$0xff]  ;;  %v1157_v31 = vpack.c.bf16 %v629_v53, %v625_v21  ;;  %p1399_p13 = por %p1398_p12, %p1397_p11 }
 0x177   :  { %1126 = vmatpush1.bf16.msra.mxu0 %v1125_v35  ;;  %1254 = vmatpush1.bf16.msra.mxu1 %v1253_v37  ;;  %v1269_v35 = vpack.c.bf16 %v599_v30, %v595_v29  ;;  %v601_v37 = vld [vmem:[#allocation7 + $0x680] sm:$0xff]  ;;  %v638_v29 = vld [vmem:[#allocation7 + $0x7a8] sm:$0xff]  ;;  %v636_v30 = vld [vmem:[#allocation7 + $0x798] sm:$0xff]  ;;  %v1285_v32 = vpack.c.bf16 %v631_v25, %v627_v24 }
 0x178   :  { %1128 = vmatprep.subr.bf16.mxu0 %v1127_v43  ;;  %1256 = vmatprep.subr.bf16.mxu1 %v1255_v45  ;;  %v603_v43 = vld [vmem:[#allocation7 + $0x690] sm:$0xff]  ;;  %v1145_v62 = vpack.c.bf16 %v605_v38, %v601_v37  ;;  %p1400_p0 = pnand %p1399_p13, %p1393_p10 }
 0x179   :  { %v607_v45 = vld [vmem:[#allocation7 + $0x6b0] sm:$0xff] }
 0x17a   :  { %v1273_v56 = vpack.c.bf16 %v607_v45, %v603_v43  ;;  %v635_v37 = vld [vmem:[#allocation7 + $0x790] sm:$0xff]  ;;  %v646_v43 = vld [vmem:[#allocation7 + $0x7e8] sm:$0xff]  ;;  %v644_v45 = vld [vmem:[#allocation7 + $0x7d8] sm:$0xff] }
 0x17b   :  { %1130 = vmatpush1.bf16.msra.mxu0 %v1129_v57  ;;  %1258 = vmatpush1.bf16.msra.mxu1 %v1257_v59  ;;  %v609_v57 = vld [vmem:[#allocation7 + $0x6c0] sm:$0xff]  ;;  %v639_v38 = vld [vmem:[#allocation7 + $0x7b0] sm:$0xff] }
 0x17c   :  { %1132 = vmatprep.subr.bf16.mxu0 %v1131_v63  ;;  %1260 = vmatprep.subr.bf16.mxu1 %v1259_v1  ;;  %v613_v59 = vld [vmem:[#allocation7 + $0x6e0] sm:$0xff]  ;;  %v615_v63 = vld [vmem:[#allocation7 + $0x6f0] sm:$0xff]  ;;  %v618_v1 = vld [vmem:[#allocation7 + $0x708] sm:$0xff]  ;;  %v1289_v49 = vpack.c.bf16 %v639_v38, %v635_v37 }
 0x17d   :  { %v1149_v8 = vpack.c.bf16 %v613_v59, %v609_v57  ;;  %v1277_v9 = vpack.c.bf16 %v615_v63, %v611_v0  ;;  %v1151_v12 = vpack.c.bf16 %v622_v3, %v618_v1  ;;  %v643_v57 = vld [vmem:[#allocation7 + $0x7d0] sm:$0xff]  ;;  %v291_v63 = vmul.f32 0.5, %v1534_v20 }
 0x17e   :  { %v647_v59 = vld [vmem:[#allocation7 + $0x7f0] sm:$0xff]  ;;  %v654_v3 = vrot.slane %v649_v2, %v129_v42  ;;  %v658_v20 = vrot.slane %v649_v2, %v133_v44 }
 0x17f   :  { %1134 = vmatpush1.bf16.msra.mxu0 %v1133_v10  ;;  %1262 = vmatpush1.bf16.msra.mxu1 %v1261_v11  ;;  %v617_v10 = vld [vmem:[#allocation7 + $0x700] sm:$0xff]  ;;  %v1293_v0 = vpack.c.bf16 %v647_v59, %v643_v57 }
 0x180   :  { %1136 = vmatprep.subr.bf16.mxu0 %v1135_v36  ;;  %1264 = vmatprep.subr.bf16.mxu1 %v1263_v15  ;;  %v621_v11 = vld [vmem:[#allocation7 + $0x720] sm:$0xff]  ;;  %v623_v36 = vld [vmem:[#allocation7 + $0x730] sm:$0xff]  ;;  %v626_v15 = vld [vmem:[#allocation7 + $0x748] sm:$0xff] }
 0x181   :  { %v1153_v52 = vpack.c.bf16 %v621_v11, %v617_v10  ;;  %v1281_v19 = vpack.c.bf16 %v623_v36, %v619_v14 }
 0x183   :  { %1138 = vmatpush1.bf16.msra.mxu0 %v1137_v22  ;;  %1266 = vmatpush1.bf16.msra.mxu1 %v1265_v23  ;;  %v1155_v22 = vpack.c.bf16 %v630_v17, %v626_v15  ;;  %v1283_v23 = vpack.c.bf16 %v632_v18, %v628_v58 }
 0x184   :  { %1140 = vmatprep.subr.bf16.mxu0 %v1139_v26  ;;  %1268 = vmatprep.subr.bf16.mxu1 %v1267_v27  ;;  %v634_v26 = vld [vmem:[#allocation7 + $0x788] sm:$0xff]  ;;  %v371_v27 = vsub.f32 1.0, %v367_v16 }
 0x187   :  { %1142 = vmatpush1.bf16.msra.mxu0 %v1141_v48  ;;  %1270 = vmatpush1.bf16.msra.mxu1 %v1269_v35  ;;  %v1159_v48 = vpack.c.bf16 %v638_v29, %v634_v26  ;;  %v1287_v35 = vpack.c.bf16 %v640_v51, %v636_v30 }
 0x188   :  { %1144 = vmatprep.subr.bf16.mxu0 %v1143_v39  ;;  %1272 = vmatprep.subr.bf16.mxu1 %v1271_v40  ;;  %v642_v39 = vld [vmem:[#allocation7 + $0x7c8] sm:$0xff]  ;;  %v379_v40 = vsub.f32 0.0, %v371_v27 }
 0x189   :  { %v1163_v55 = vpack.c.bf16 %v646_v43, %v642_v39 }
 0x18b   :  { %1146 = vmatpush1.bf16.msra.mxu0 %v1145_v62  ;;  %1274 = vmatpush1.bf16.msra.mxu1 %v1273_v56  ;;  %v1291_v62 = vpack.c.bf16 %v648_v46, %v644_v45  ;;  %v645_v56 = vld [vmem:[#allocation7 + $0x7e0] sm:$0xff] }
 0x18c   :  { %1148 = vmatprep.subr.bf16.mxu0 %v1147_v60  ;;  %1276 = vmatprep.subr.bf16.mxu1 %v1275_v61  ;;  %v383_v60 = vsel %vm375_vm3, %v371_v27, %v379_v40  ;;  %v1165_v61 = vpack.c.bf16 %v645_v56, %v641_v54 }
 0x18d   :  { %v387_v28 = vadd.f32 1.0, %v383_v60 }
 0x18f   :  { %1150 = vmatpush1.bf16.msra.mxu0 %v1149_v8  ;;  %1278 = vmatpush1.bf16.msra.mxu1 %v1277_v9  ;;  %v391_v1 = vmul.f32 %v387_v28, %v291_v63 }
 0x190   :  { %1152 = vmatprep.subr.bf16.mxu0 %v1151_v12  ;;  %1280 = vmatprep.subr.bf16.mxu1 %v1279_v13 }
 0x193   :  { %1154 = vmatpush1.bf16.msra.mxu0 %v1153_v52  ;;  %1282 = vmatpush1.bf16.msra.mxu1 %v1281_v19 }
 0x194   :  { %1156 = vmatprep.subr.bf16.mxu0 %v1155_v22  ;;  %1284 = vmatprep.subr.bf16.mxu1 %v1283_v23 }
 0x197   :  { %1158 = vmatpush1.bf16.msra.mxu0 %v1157_v31  ;;  %1286 = vmatpush1.bf16.msra.mxu1 %v1285_v32 }
 0x198   :  { %1160 = vmatprep.subr.bf16.mxu0 %v1159_v48  ;;  %1288 = vmatprep.subr.bf16.mxu1 %v1287_v35 }
 0x19b   :  { %1162 = vmatpush1.bf16.msra.mxu0 %v1161_v47  ;;  %1290 = vmatpush1.bf16.msra.mxu1 %v1289_v49 }
 0x19c   :  { %1164 = vmatprep.subr.bf16.mxu0 %v1163_v55  ;;  %1292 = vmatprep.subr.bf16.mxu1 %v1291_v62 }
 0x19f   :  { %1166 = vmatpush1.bf16.msra.mxu0 %v1165_v61  ;;  %1294 = vmatpush1.bf16.msra.mxu1 %v1293_v0 }
 0x1a2   :  { %807 = vmatmul.mubr.f32.vlgmr.msra.gmra.mrb[2].mxu0 %v391_v1  ;;  %949 = vmatmul.mubr.f32.vlgmr.msra.gmra.mrb[2].mxu1 %v391_v1 }
 0x275   :  { %v808_v7 = vpop.f32.mrb[2].mxu0  ;;  %v950_v8 = vpop.f32.mrb[2].mxu1 }
 0x276   :  { %v1295_v9 = vadd.f32 %v808_v7, %v654_v3  ;;  %v1297_v10 = vadd.f32 %v950_v8, %v662_v4  ;;  %v810_v11 = vpop.f32.mrb[3].mxu0  ;;  %v952_v12 = vpop.f32.mrb[3].mxu1 }
 0x277   :  { %v1296_v13 = vadd.f32 %v810_v11, %v658_v20  ;;  %v1298_v14 = vadd.f32 %v952_v12, %v666_v5 }
 0x278   :  { %955 = vst [vmem:[#allocation8] sm:$0xff] %v1295_v9  ;;  %957 = vst [vmem:[#allocation8 + $0x10] sm:$0xff] %v1297_v10 }
 0x279   :  { %956 = vst [vmem:[#allocation8 + $0x8] sm:$0xff] %v1296_v13  ;;  %958 = vst [vmem:[#allocation8 + $0x18] sm:$0xff] %v1298_v14 }
 0x27a   :  { %1403 = shalt.err (!%p1400_p0)
}
 0x27b   :  { %s1404_s10 = scalar_lea.hbm %s1590_s5, 512 }
 0x27c   :  { %p1405_p1 = scmp.ne.s32.totalorder %s1590_s5, %s1404_s10  ;;  %p1408_p2 = scmp.lt.u32.totalorder %s1404_s10, %s1590_s5 }
 0x27e   :  { %p1410_p3 = pnand %p1408_p2, %p1405_p1 }
 0x280   :  { %1413 = shalt.err (!%p1410_p3)
}
 0x281   :  { %968 = dma.vmem_to_hbm [thread:$0]  %s966_s7, 512, %s1590_s5, [#allocation4]  }
 0x282   :  { %1418 = dma.done.wait [#allocation4], 512  }
 0x283   :  { %1419 = vsyncadd [#allocation4], 4294966784 }
 0x284   :  { %972 = vsyncpa [#allocation3], 1 }
 0x285   :  { %973 = vsyncpa [#allocation6], 1 }
 0x286   :  { %974 = vsyncpa [#allocation4], 1 }

</bundles_post_ra>
